<compile_context>
chip_gen: v6e
topology: v6e:2x2x1
jax: 0.10.0
libtpu: 0.0.40
codegen_flags: <defaults>
</compile_context>

<pallas_src>
import functools

import jax
import jax.numpy as jnp
from jax.experimental import pallas as pl
from jax.experimental.pallas import tpu as pltpu


# ------------------------------ Pallas kernels ------------------------------ #
def _conv3x3_bias_relu_kernel(xp_ref, w_ref, b_ref, o_ref, *, rows, width):
    """Fused 3x3 conv (stride 1) + bias + ReLU for one (batch, row-block).

    xp_ref: (1, 1, rows+2, width+2, Cin)  reflect-padded input slab (bf16)
    w_ref:  (9*Cin, Cout)                 taps folded into the contraction (bf16)
    b_ref:  (1, Cout)                     float32 bias
    o_ref:  (1, rows*width, Cout)         bf16 conv1 output rows for this block
    """
    cin = xp_ref.shape[-1]
    # Build the 9 shifted tap views with static slices (no HBM duplication),
    # fold (kh, kw, ci) into one contraction axis -> a single MXU dot.
    pieces = []
    for kh in range(3):
        for kw in range(3):
            pieces.append(xp_ref[0, 0, kh:kh + rows, kw:kw + width, :])
    taps = jnp.concatenate(pieces, axis=-1)          # (rows, width, 9*Cin)
    taps = taps.reshape(rows * width, 9 * cin)       # width % 8 == 0 -> cheap
    acc = jnp.dot(taps, w_ref[...], preferred_element_type=jnp.float32)
    acc = jnp.maximum(acc + b_ref[...], 0.0)
    o_ref[0] = acc.astype(o_ref.dtype)


def _matmul_bias_relu_kernel(x_ref, w_ref, b_ref, o_ref):
    """Fused (P, K) @ (K, Cout) + bias + ReLU for one batch element."""
    acc = jnp.dot(x_ref[0], w_ref[...], preferred_element_type=jnp.float32)
    o_ref[0] = jnp.maximum(acc + b_ref[...], 0.0).astype(o_ref.dtype)


# ------------------------------- pallas_call -------------------------------- #
def _conv3x3_call(xp_slabs, w1f, b1, *, rows, width):
    """xp_slabs: (N, RB, rows+2, width+2, Cin) -> (N, RB*rows*width, Cout)."""
    n, rb, rows_p2, width_p2, cin = xp_slabs.shape
    cout = w1f.shape[-1]
    p = rows * width
    kernel = functools.partial(_conv3x3_bias_relu_kernel, rows=rows, width=width)
    return pl.pallas_call(
        kernel,
        out_shape=jax.ShapeDtypeStruct((n, rb * p, cout), jnp.bfloat16),
        grid=(n, rb),
        in_specs=[
            pl.BlockSpec((1, 1, rows_p2, width_p2, cin),
                         lambda i, r: (i, r, 0, 0, 0)),
            pl.BlockSpec((9 * cin, cout), lambda i, r: (0, 0)),
            pl.BlockSpec((1, cout), lambda i, r: (0, 0)),
        ],
        out_specs=pl.BlockSpec((1, p, cout), lambda i, r: (i, r, 0)),
        compiler_params=pltpu.CompilerParams(
            dimension_semantics=("parallel", "parallel"),
            vmem_limit_bytes=32 * 1024 * 1024,
        ),
    )(xp_slabs, w1f, b1)


def _matmul_bias_relu_call(x, w, b):
    """x: (N, P, K), w: (K, Cout), b: (1, Cout) -> (N, P, Cout) float32."""
    n, p, k = x.shape
    cout = w.shape[-1]
    return pl.pallas_call(
        _matmul_bias_relu_kernel,
        out_shape=jax.ShapeDtypeStruct((n, p, cout), jnp.float32),
        grid=(n,),
        in_specs=[
            pl.BlockSpec((1, p, k), lambda i: (i, 0, 0)),
            pl.BlockSpec((k, cout), lambda i: (0, 0)),
            pl.BlockSpec((1, cout), lambda i: (0, 0)),
        ],
        out_specs=pl.BlockSpec((1, p, cout), lambda i: (i, 0, 0)),
        compiler_params=pltpu.CompilerParams(
            dimension_semantics=("parallel",),
            vmem_limit_bytes=32 * 1024 * 1024,
        ),
    )(x, w, b)


# --------------------------------- wrapper ---------------------------------- #
@functools.partial(jax.jit, static_argnames=("row_block",))
def encoder_block_forward(x_nchw, w1, b1, w2, b2, *, row_block=8):
    """Pallas implementation of _EncoderBlock.forward (NCHW in / NCHW out).

    x_nchw: (N, Cin, H, W); w1: (Cout, Cin, 3, 3); w2: (Cout, Cout, 2, 2).
    """
    n, cin, h, w = x_nchw.shape
    cout = w1.shape[0]
    assert h % 2 == 0 and w % 2 == 0, "even spatial dims expected"
    assert w % 8 == 0, "W must be a multiple of 8 (sublane tiling)"
    assert h % row_block == 0, "H must be divisible by row_block"
    rb = h // row_block

    # bf16 activations/weights, f32 accumulation (performance-review item).
    xb = jnp.transpose(x_nchw, (0, 2, 3, 1)).astype(jnp.bfloat16)      # NHWC
    w1f = jnp.transpose(w1, (2, 3, 1, 0)).reshape(9 * cin, cout).astype(jnp.bfloat16)
    w2f = jnp.transpose(w2, (2, 3, 1, 0)).reshape(4 * cout, cout).astype(jnp.bfloat16)
    b1r = b1.reshape(1, cout).astype(jnp.float32)
    b2r = b2.reshape(1, cout).astype(jnp.float32)

    # --- conv1: 3x3, reflect pad 1, stride 1, + ReLU (Pallas) ---
    xp = jnp.pad(xb, ((0, 0), (1, 1), (1, 1), (0, 0)), mode="reflect")
    # Row-block halo slabs: tiny (row_block+2)/row_block duplication; gives a
    # spatial grid axis without overlapping BlockSpecs.
    slabs = jnp.stack(
        [xp[:, r * row_block: r * row_block + row_block + 2] for r in range(rb)],
        axis=1)                                   # (N, RB, row_block+2, W+2, Cin)
    h1 = _conv3x3_call(slabs, w1f, b1r, rows=row_block, width=w)  # (N, H*W, Cout) bf16
    h1 = h1.reshape(n, h, w, cout)

    # --- conv2: 2x2, reflect pad 1, stride 2, + ReLU (Pallas) ---
    # After reflect padding, the 2x2 stride-2 windows tile (H+2, W+2) exactly,
    # so the tap layout is a duplication-free pixel-unshuffle (pure layout).
    h1p = jnp.pad(h1, ((0, 0), (1, 1), (1, 1), (0, 0)), mode="reflect")
    ho, wo = h // 2 + 1, w // 2 + 1
    t2 = h1p.reshape(n, ho, 2, wo, 2, cout)
    t2 = jnp.transpose(t2, (0, 1, 3, 2, 4, 5)).reshape(n, ho * wo, 4 * cout)
    y = _matmul_bias_relu_call(t2, w2f, b2r)                      # (N, Ho*Wo, Cout)

    return jnp.transpose(y.reshape(n, ho, wo, cout), (0, 3, 1, 2))  # NCHW


# ---------------------------- pure-JAX reference ----------------------------- #
def _reference_forward(x, w1, b1, w2, b2):
    xp = jnp.pad(x, ((0, 0), (0, 0), (1, 1), (1, 1)), mode="reflect")
    y = jax.lax.conv_general_dilated(
        xp, w1, (1, 1), "VALID", dimension_numbers=("NCHW", "OIHW", "NCHW"),
        precision=jax.lax.Precision.HIGHEST,
    ) + b1[None, :, None, None]
    y = jax.nn.relu(y)
    yp = jnp.pad(y, ((0, 0), (0, 0), (1, 1), (1, 1)), mode="reflect")
    z = jax.lax.conv_general_dilated(
        yp, w2, (2, 2), "VALID", dimension_numbers=("NCHW", "OIHW", "NCHW"),
        precision=jax.lax.Precision.HIGHEST,
    ) + b2[None, :, None, None]
    return jax.nn.relu(z)


# ----------------------------------- main ------------------------------------ #
if __name__ == "__main__":
    key = jax.random.PRNGKey(0)
    k_x, k_w1, k_b1, k_w2, k_b2 = jax.random.split(key, 5)

    N, Cin, Cout, H, W = 2, 4, 8, 16, 16

    x = jax.random.normal(k_x, (N, Cin, H, W), dtype=jnp.float32)
    # Deterministic synthetic parameters (shapes from nn.Conv2d in __init__).
    w1 = jax.random.normal(k_w1, (Cout, Cin, 3, 3), dtype=jnp.float32) * 0.2
    b1 = jax.random.normal(k_b1, (Cout,), dtype=jnp.float32) * 0.1
    w2 = jax.random.normal(k_w2, (Cout, Cout, 2, 2), dtype=jnp.float32) * 0.2
    b2 = jax.random.normal(k_b2, (Cout,), dtype=jnp.float32) * 0.1

    out = jax.block_until_ready(encoder_block_forward(x, w1, b1, w2, b2))

    # Reference on the same bf16-rounded inputs/weights (the kernel path uses
    # bf16 storage with f32 accumulation; only the bf16 h1 round trip differs).
    rnd = lambda a: a.astype(jnp.bfloat16).astype(jnp.float32)
    ref = jax.block_until_ready(
        _reference_forward(rnd(x), rnd(w1), b1, rnd(w2), b2))

    assert out.shape == (N, Cout, H // 2 + 1, W // 2 + 1), out.shape
    assert out.dtype == jnp.float32
    max_err = float(jnp.max(jnp.abs(out - ref)))
    assert jnp.allclose(out, ref, atol=2e-2, rtol=2e-2), max_err

    print("KERNEL_OK")
</pallas_src>

<mosaic_0001>
module attributes {stable_mosaic.version = 11 : i64} {
  func.func @_conv3x3_bias_relu_kernel(%arg0: i32, %arg1: i32, %arg2: memref<1x1x10x18x4xbf16, #tpu.memory_space<vmem>>, %arg3: memref<36x8xbf16, #tpu.memory_space<vmem>>, %arg4: memref<1x8xf32, #tpu.memory_space<vmem>>, %arg5: memref<1x128x8xbf16, #tpu.memory_space<vmem>>) attributes {dimension_semantics = [#tpu.dimension_semantics<parallel>, #tpu.dimension_semantics<parallel>], iteration_bounds = array<i64: 2, 2>, scalar_prefetch = 0 : i64, scratch_operands = 0 : i64, tpu.core_type = #tpu.core_type<tc>, window_params = [{transform_indices = @transform_0, window_bounds = array<i64: 1, 1, 10, 18, 4>}, {pipeline_mode = #tpu.pipeline_mode<synchronous>, transform_indices = @transform_1, window_bounds = array<i64: 36, 8>}, {pipeline_mode = #tpu.pipeline_mode<synchronous>, transform_indices = @transform_2, window_bounds = array<i64: 1, 8>}, {transform_indices = @transform_3, window_bounds = array<i64: 1, 128, 8>}]} {
    %c0 = arith.constant 0 : index
    %c0_0 = arith.constant 0 : index
    %c0_1 = arith.constant 0 : index
    %c0_2 = arith.constant 0 : index
    %c0_3 = arith.constant 0 : index
    %0 = vector.load %arg2[%c0, %c0_0, %c0_1, %c0_2, %c0_3] : memref<1x1x10x18x4xbf16, #tpu.memory_space<vmem>>, vector<1x1x8x16x4xbf16>
    %1 = vector.shape_cast %0 : vector<1x1x8x16x4xbf16> to vector<8x16x4xbf16>
    %c0_4 = arith.constant 0 : index
    %c0_5 = arith.constant 0 : index
    %c0_6 = arith.constant 0 : index
    %c1 = arith.constant 1 : index
    %c0_7 = arith.constant 0 : index
    %2 = vector.load %arg2[%c0_4, %c0_5, %c0_6, %c1, %c0_7] : memref<1x1x10x18x4xbf16, #tpu.memory_space<vmem>>, vector<1x1x8x16x4xbf16>
    %3 = vector.shape_cast %2 : vector<1x1x8x16x4xbf16> to vector<8x16x4xbf16>
    %c0_8 = arith.constant 0 : index
    %c0_9 = arith.constant 0 : index
    %c0_10 = arith.constant 0 : index
    %c2 = arith.constant 2 : index
    %c0_11 = arith.constant 0 : index
    %4 = vector.load %arg2[%c0_8, %c0_9, %c0_10, %c2, %c0_11] : memref<1x1x10x18x4xbf16, #tpu.memory_space<vmem>>, vector<1x1x8x16x4xbf16>
    %5 = vector.shape_cast %4 : vector<1x1x8x16x4xbf16> to vector<8x16x4xbf16>
    %c0_12 = arith.constant 0 : index
    %c0_13 = arith.constant 0 : index
    %c1_14 = arith.constant 1 : index
    %c0_15 = arith.constant 0 : index
    %c0_16 = arith.constant 0 : index
    %6 = vector.load %arg2[%c0_12, %c0_13, %c1_14, %c0_15, %c0_16] : memref<1x1x10x18x4xbf16, #tpu.memory_space<vmem>>, vector<1x1x8x16x4xbf16>
    %7 = vector.shape_cast %6 : vector<1x1x8x16x4xbf16> to vector<8x16x4xbf16>
    %c0_17 = arith.constant 0 : index
    %c0_18 = arith.constant 0 : index
    %c1_19 = arith.constant 1 : index
    %c1_20 = arith.constant 1 : index
    %c0_21 = arith.constant 0 : index
    %8 = vector.load %arg2[%c0_17, %c0_18, %c1_19, %c1_20, %c0_21] : memref<1x1x10x18x4xbf16, #tpu.memory_space<vmem>>, vector<1x1x8x16x4xbf16>
    %9 = vector.shape_cast %8 : vector<1x1x8x16x4xbf16> to vector<8x16x4xbf16>
    %c0_22 = arith.constant 0 : index
    %c0_23 = arith.constant 0 : index
    %c1_24 = arith.constant 1 : index
    %c2_25 = arith.constant 2 : index
    %c0_26 = arith.constant 0 : index
    %10 = vector.load %arg2[%c0_22, %c0_23, %c1_24, %c2_25, %c0_26] : memref<1x1x10x18x4xbf16, #tpu.memory_space<vmem>>, vector<1x1x8x16x4xbf16>
    %11 = vector.shape_cast %10 : vector<1x1x8x16x4xbf16> to vector<8x16x4xbf16>
    %c0_27 = arith.constant 0 : index
    %c0_28 = arith.constant 0 : index
    %c2_29 = arith.constant 2 : index
    %c0_30 = arith.constant 0 : index
    %c0_31 = arith.constant 0 : index
    %12 = vector.load %arg2[%c0_27, %c0_28, %c2_29, %c0_30, %c0_31] : memref<1x1x10x18x4xbf16, #tpu.memory_space<vmem>>, vector<1x1x8x16x4xbf16>
    %13 = vector.shape_cast %12 : vector<1x1x8x16x4xbf16> to vector<8x16x4xbf16>
    %c0_32 = arith.constant 0 : index
    %c0_33 = arith.constant 0 : index
    %c2_34 = arith.constant 2 : index
    %c1_35 = arith.constant 1 : index
    %c0_36 = arith.constant 0 : index
    %14 = vector.load %arg2[%c0_32, %c0_33, %c2_34, %c1_35, %c0_36] : memref<1x1x10x18x4xbf16, #tpu.memory_space<vmem>>, vector<1x1x8x16x4xbf16>
    %15 = vector.shape_cast %14 : vector<1x1x8x16x4xbf16> to vector<8x16x4xbf16>
    %c0_37 = arith.constant 0 : index
    %c0_38 = arith.constant 0 : index
    %c2_39 = arith.constant 2 : index
    %c2_40 = arith.constant 2 : index
    %c0_41 = arith.constant 0 : index
    %16 = vector.load %arg2[%c0_37, %c0_38, %c2_39, %c2_40, %c0_41] : memref<1x1x10x18x4xbf16, #tpu.memory_space<vmem>>, vector<1x1x8x16x4xbf16>
    %17 = vector.shape_cast %16 : vector<1x1x8x16x4xbf16> to vector<8x16x4xbf16>
    %18 = tpu.concatenate %1, %3, %5, %7, %9, %11, %13, %15, %17 in 2 : vector<8x16x4xbf16>, vector<8x16x4xbf16>, vector<8x16x4xbf16>, vector<8x16x4xbf16>, vector<8x16x4xbf16>, vector<8x16x4xbf16>, vector<8x16x4xbf16>, vector<8x16x4xbf16>, vector<8x16x4xbf16> -> vector<8x16x36xbf16>
    %19 = vector.shape_cast %18 : vector<8x16x36xbf16> to vector<128x36xbf16>
    %c0_42 = arith.constant 0 : index
    %c0_43 = arith.constant 0 : index
    %20 = vector.load %arg3[%c0_42, %c0_43] : memref<36x8xbf16, #tpu.memory_space<vmem>>, vector<36x8xbf16>
    %cst = arith.constant dense<0.000000e+00> : vector<128x8xf32>
    %21 = tpu.matmul %19, %20, %cst {dimension_numbers = #tpu.dot_dimension_numbers<[1], [0], [0], [1], [0, 0, 1, 1], [], []>} : vector<128x36xbf16>, vector<36x8xbf16>, vector<128x8xf32> -> vector<128x8xf32>
    %c0_44 = arith.constant 0 : index
    %c0_45 = arith.constant 0 : index
    %22 = vector.load %arg4[%c0_44, %c0_45] : memref<1x8xf32, #tpu.memory_space<vmem>>, vector<1x8xf32>
    %23 = vector.broadcast %22 : vector<1x8xf32> to vector<128x8xf32>
    %24 = arith.addf %21, %23 : vector<128x8xf32>
    %cst_46 = arith.constant 0.000000e+00 : f32
    %25 = vector.broadcast %cst_46 : f32 to vector<128x8xf32>
    %26 = arith.maximumf %24, %25 : vector<128x8xf32>
    %27 = arith.truncf %26 : vector<128x8xf32> to vector<128x8xbf16>
    %c0_47 = arith.constant 0 : index
    %c0_48 = arith.constant 0 : index
    %c0_49 = arith.constant 0 : index
    %28 = vector.load %arg5[%c0_47, %c0_48, %c0_49] : memref<1x128x8xbf16, #tpu.memory_space<vmem>>, vector<1x128x8xbf16>
    %29 = vector.shape_cast %28 : vector<1x128x8xbf16> to vector<128x8xbf16>
    %30 = vector.shape_cast %27 : vector<128x8xbf16> to vector<1x128x8xbf16>
    tpu.vector_store %arg5[%c0_47, %c0_48, %c0_49], %30 {strides = array<i32>} : memref<1x128x8xbf16, #tpu.memory_space<vmem>>, vector<1x128x8xbf16>,
    return
  }
  func.func @transform_0(%arg0: i32, %arg1: i32) -> (i32, i32, i32, i32, i32) {
    %c0_i32 = arith.constant 0 : i32
    %c0_i32_0 = arith.constant 0 : i32
    %c0_i32_1 = arith.constant 0 : i32
    %c0_i32_2 = arith.constant 0 : i32
    return %arg0, %arg1, %c0_i32, %c0_i32_0, %c0_i32_1 : i32, i32, i32, i32, i32
  }
  func.func @transform_1(%arg0: i32, %arg1: i32) -> (i32, i32) {
    %c0_i32 = arith.constant 0 : i32
    %c0_i32_0 = arith.constant 0 : i32
    %c0_i32_1 = arith.constant 0 : i32
    return %c0_i32, %c0_i32_0 : i32, i32
  }
  func.func @transform_2(%arg0: i32, %arg1: i32) -> (i32, i32) {
    %c0_i32 = arith.constant 0 : i32
    %c0_i32_0 = arith.constant 0 : i32
    %c0_i32_1 = arith.constant 0 : i32
    return %c0_i32, %c0_i32_0 : i32, i32
  }
  func.func @transform_3(%arg0: i32, %arg1: i32) -> (i32, i32, i32) {
    %c0_i32 = arith.constant 0 : i32
    %c0_i32_0 = arith.constant 0 : i32
    return %arg0, %arg1, %c0_i32 : i32, i32, i32
  }
}

module attributes {stable_mosaic.version = 11 : i64} {
  func.func @_matmul_bias_relu_kernel(%arg0: i32, %arg1: memref<1x81x32xbf16, #tpu.memory_space<vmem>>, %arg2: memref<32x8xbf16, #tpu.memory_space<vmem>>, %arg3: memref<1x8xf32, #tpu.memory_space<vmem>>, %arg4: memref<1x81x8xf32, #tpu.memory_space<vmem>>) attributes {dimension_semantics = [#tpu.dimension_semantics<parallel>], iteration_bounds = array<i64: 2>, scalar_prefetch = 0 : i64, scratch_operands = 0 : i64, tpu.core_type = #tpu.core_type<tc>, window_params = [{transform_indices = @transform_0, window_bounds = array<i64: 1, 81, 32>}, {pipeline_mode = #tpu.pipeline_mode<synchronous>, transform_indices = @transform_1, window_bounds = array<i64: 32, 8>}, {pipeline_mode = #tpu.pipeline_mode<synchronous>, transform_indices = @transform_2, window_bounds = array<i64: 1, 8>}, {transform_indices = @transform_3, window_bounds = array<i64: 1, 81, 8>}]} {
    %c0 = arith.constant 0 : index
    %c0_0 = arith.constant 0 : index
    %c0_1 = arith.constant 0 : index
    %0 = vector.load %arg1[%c0, %c0_0, %c0_1] : memref<1x81x32xbf16, #tpu.memory_space<vmem>>, vector<1x81x32xbf16>
    %1 = vector.shape_cast %0 : vector<1x81x32xbf16> to vector<81x32xbf16>
    %c0_2 = arith.constant 0 : index
    %c0_3 = arith.constant 0 : index
    %2 = vector.load %arg2[%c0_2, %c0_3] : memref<32x8xbf16, #tpu.memory_space<vmem>>, vector<32x8xbf16>
    %cst = arith.constant dense<0.000000e+00> : vector<81x8xf32>
    %3 = tpu.matmul %1, %2, %cst {dimension_numbers = #tpu.dot_dimension_numbers<[1], [0], [0], [1], [0, 0, 1, 1], [], []>} : vector<81x32xbf16>, vector<32x8xbf16>, vector<81x8xf32> -> vector<81x8xf32>
    %c0_4 = arith.constant 0 : index
    %c0_5 = arith.constant 0 : index
    %4 = vector.load %arg3[%c0_4, %c0_5] : memref<1x8xf32, #tpu.memory_space<vmem>>, vector<1x8xf32>
    %5 = vector.broadcast %4 : vector<1x8xf32> to vector<81x8xf32>
    %6 = arith.addf %3, %5 : vector<81x8xf32>
    %cst_6 = arith.constant 0.000000e+00 : f32
    %7 = vector.broadcast %cst_6 : f32 to vector<81x8xf32>
    %8 = arith.maximumf %6, %7 : vector<81x8xf32>
    %c0_7 = arith.constant 0 : index
    %c0_8 = arith.constant 0 : index
    %c0_9 = arith.constant 0 : index
    %9 = vector.load %arg4[%c0_7, %c0_8, %c0_9] : memref<1x81x8xf32, #tpu.memory_space<vmem>>, vector<1x81x8xf32>
    %10 = vector.shape_cast %9 : vector<1x81x8xf32> to vector<81x8xf32>
    %11 = vector.shape_cast %8 : vector<81x8xf32> to vector<1x81x8xf32>
    tpu.vector_store %arg4[%c0_7, %c0_8, %c0_9], %11 {strides = array<i32>} : memref<1x81x8xf32, #tpu.memory_space<vmem>>, vector<1x81x8xf32>,
    return
  }
  func.func @transform_0(%arg0: i32) -> (i32, i32, i32) {
    %c0_i32 = arith.constant 0 : i32
    %c0_i32_0 = arith.constant 0 : i32
    %c0_i32_1 = arith.constant 0 : i32
    return %arg0, %c0_i32, %c0_i32_0 : i32, i32, i32
  }
  func.func @transform_1(%arg0: i32) -> (i32, i32) {
    %c0_i32 = arith.constant 0 : i32
    %c0_i32_0 = arith.constant 0 : i32
    %c0_i32_1 = arith.constant 0 : i32
    return %c0_i32, %c0_i32_0 : i32, i32
  }
  func.func @transform_2(%arg0: i32) -> (i32, i32) {
    %c0_i32 = arith.constant 0 : i32
    %c0_i32_0 = arith.constant 0 : i32
    %c0_i32_1 = arith.constant 0 : i32
    return %c0_i32, %c0_i32_0 : i32, i32
  }
  func.func @transform_3(%arg0: i32) -> (i32, i32, i32) {
    %c0_i32 = arith.constant 0 : i32
    %c0_i32_0 = arith.constant 0 : i32
    %c0_i32_1 = arith.constant 0 : i32
    return %arg0, %c0_i32, %c0_i32_0 : i32, i32, i32
  }
}

</mosaic_0001>

<bundles_post_ra>
// kernel: encoder_block_forward.3
= control target key start
LH: loop header
LB: loop body
LE: loop exit
PB: predicated region body
PF: predicated region fallthrough
CT: control target
= control target key end

     0   :  { %s510_s12 = smov 0   ;;  %s559_s0 = inlined_call_operand.vmem [shape: bf16[2,81,32], index: 0, kind: input, shape index: {}]   ;;  %s560_s1 = inlined_call_operand.vmem [shape: bf16[32,8], index: 1, kind: input, shape index: {}]   ;;  %s561_s2 = inlined_call_operand.vmem [shape: f32[1,8], index: 2, kind: input, shape index: {}]   ;;  %s562_s3 = inlined_call_operand.vmem [shape: f32[2,81,8], index: 3, kind: output, shape index: {}]  }
   0x1 LB: > { %s412_s13 = sadd.s32 4294967295, %s488_s12   ;;  %p416_p0 = scmp.ge.s32.totalorder %s488_s12, 1  ;;  %s488_s12 = sphi %s510_s12, %s13_s12  }
   0x2   : > { %p137_p1 = scmp.lt.s32.totalorder %s488_s12, 3 }
   0x4   : > { %p138_p2 = pnand %p416_p0, %p137_p1 }
   0x5   : > { %p161_p3 = scmp.lt.s32.totalorder (!%p138_p2), %s412_s13, 1 }
   0x6   : > { %141 = sbr.rel (%p138_p2) target bundleno = 232 (0xe8), region = 32 }
   0xb   : > { %v474_v0 = vld [vmem:[%s560_s1 + $0x8] sm:$0xff]   ;;  %v475_v1 = vld [vmem:[%s560_s1] sm:$0xff]   ;;  %s564_s13 = smov (!%p161_p3, %s412_s13), 1  ;;  %vm234_vm0 = vcmask 261120   ;;  %vm344_vm1 = vcmask 64512   ;;  %vm355_vm2 = vcmask 57344  }
   0xc   : > { %460 = vmatprep.subr.bf16.mxu1 %v474_v0  ;;  %444 = vmatprep.subr.bf16.mxu0 %v474_v0  ;;  %s464_s18 = smul.u32 44, %s564_s13  ;;  %v419_v8 = vld [vmem:[%s561_s2] ss:$0 sm:$0xff] }
   0xd   : > { %462 = vmatpush3.bf16.msra.mxu1 %v474_v0  ;;  %445 = vmatpush3.bf16.msra.mxu0 %v474_v0  ;;  %s465_s22 = smul.u32 88, %s564_s13 }
   0xe   : > { %461 = vmatprep.subr.bf16.mxu1 %v475_v1  ;;  %446 = vmatprep.subr.bf16.mxu0 %v475_v1  ;;  %s165_s21 = scalar_lea.vmem %s559_s0, %s464_s18 }
   0xf   : > { %v476_v2 = vld [vmem:[%s165_s21 + $0x10] sm:$0xff]   ;;  %v477_v3 = vld [vmem:[%s165_s21 + $0x18] sm:$0xff]   ;;  %v478_v4 = vld [vmem:[%s165_s21] sm:$0xff]   ;;  %s533_s27 = scalar_lea.vmem %s562_s3, %s465_s22 }
  0x10   : > { %452 = vmatprep.mubr.msk.bf16.mxu1 %vm234_vm0, %v476_v2  ;;  %v479_v5 = vld [vmem:[%s165_s21 + $0x8] sm:$0xff]   ;;  %448 = vmatprep.mubr.msk.bf16.mxu0 %vm234_vm0, %v478_v4  ;;  %v480_v6 = vld [vmem:[%s165_s21 + $0x20] sm:$0xff]  }
  0x11   : > { %463 = vmatpush3.bf16.msra.mxu1 %v475_v1  ;;  %447 = vmatpush3.bf16.msra.mxu0 %v475_v1  ;;  %v481_v7 = vld [vmem:[%s165_s21 + $0x28] ss:$0 sps:$4 sm:$0x11]  }
  0x14   : > { %453 = vmatmul.mubr.msk.bf16.vlgmr.msra.gmra.mxu1 %vm234_vm0, %v477_v3  ;;  %449 = vmatmul.mubr.msk.bf16.vlgmr.msra.gmra.mxu0 %vm234_vm0, %v479_v5 }
  0x15   : > { %456 = vmatprep.mubr.msk.bf16.mxu1 %vm234_vm0, %v480_v6 }
  0x1c   : > { %457 = vmatmul.mubr.msk.bf16.gmra.mxu1 %vm234_vm0, %v481_v7 }
  0xd4   : > { %v454_v9 = vpop.f32.mrf.mxu1  ;;  %v450_v11 = vpop.f32.mrf.mxu0 }
  0xd5   : > { %v312_v10 = vadd.f32 %v454_v9, %v419_v8  ;;  %v296_v14 = vadd.f32 %v450_v11, %v419_v8 }
  0xd6   : > { %v303_v12 = vpop.f32.mrf.mxu1  ;;  %v287_v16 = vpop.f32.mrf.mxu0 }
  0xd7   : > { %v339_v13 = vmax.f32 %v312_v10, 0.0  ;;  %v304_v15 = vadd.f32 %v419_v8, %v303_v12  ;;  %v335_v18 = vmax.f32 %v296_v14, 0.0  ;;  %v288_v20 = vadd.f32 %v419_v8, %v287_v16 }
  0xd8   : > { %v455_v17 = vpop.f32.mrf.mxu1  ;;  %v451_v22 = vpop.f32.mrf.mxu0 }
  0xd9   : > { %351 = vst.msk [vmem:[%s533_s27 + $0x30] sm:$0xff] %vm344_vm1, %v339_v13  ;;  %v337_v19 = vmax.f32 %v304_v15, 0.0  ;;  %v315_v21 = vadd.f32 %v455_v17, %v419_v8  ;;  %347 = vst.msk [vmem:[%s533_s27 + $0x10] sm:$0xff] %vm344_vm1, %v335_v18  ;;  %v333_v24 = vmax.f32 %v288_v20, 0.0  ;;  %v299_v26 = vadd.f32 %v451_v22, %v419_v8 }
  0xda   : > { %v306_v23 = vpop.f32.mrf.mxu1  ;;  %v290_v28 = vpop.f32.mrf.mxu0 }
  0xdb   : > { %349 = vst.msk [vmem:[%s533_s27 + $0x20] sm:$0xff] %vm344_vm1, %v337_v19  ;;  %v340_v25 = vmax.f32 %v315_v21, 0.0  ;;  %v307_v27 = vadd.f32 %v419_v8, %v306_v23  ;;  %345 = vst.msk [vmem:[%s533_s27] sm:$0xff] %vm344_vm1, %v333_v24  ;;  %v336_v30 = vmax.f32 %v299_v26, 0.0  ;;  %v291_v32 = vadd.f32 %v419_v8, %v290_v28 }
  0xdc   : > { %v458_v29 = vpop.f32.mrf.mxu1 }
  0xdd   : > { %352 = vst.msk [vmem:[%s533_s27 + $0x38] sm:$0xff] %vm344_vm1, %v340_v25  ;;  %v338_v31 = vmax.f32 %v307_v27, 0.0  ;;  %v328_v33 = vadd.f32 %v458_v29, %v419_v8  ;;  %348 = vst.msk [vmem:[%s533_s27 + $0x18] sm:$0xff] %vm344_vm1, %v336_v30  ;;  %v334_v35 = vmax.f32 %v291_v32, 0.0 }
  0xde   : > { %v319_v34 = vpop.f32.mrf.mxu1 }
  0xdf   : > { %350 = vst.msk [vmem:[%s533_s27 + $0x28] sm:$0xff] %vm344_vm1, %v338_v31  ;;  %v343_v36 = vmax.f32 %v328_v33, 0.0  ;;  %v320_v37 = vadd.f32 %v419_v8, %v319_v34  ;;  %346 = vst.msk [vmem:[%s533_s27 + $0x8] sm:$0xff] %vm344_vm1, %v334_v35 }
  0xe0   : > { %v459_v38 = vpop.f32.mrf.mxu1 }
  0xe1   : > { %356 = vst.msk [vmem:[%s533_s27 + $0x50] sm:$0x1] %vm355_vm2, %v343_v36  ;;  %v341_v39 = vmax.f32 %v320_v37, 0.0 }
  0xe2   : > { %v322_v40 = vpop.f32.mrf.mxu1 }
  0xe3   : > { %353 = vst.msk [vmem:[%s533_s27 + $0x40] sm:$0xff] %vm344_vm1, %v341_v39  ;;  %v323_v41 = vadd.f32 %v419_v8, %v322_v40 }
  0xe5   : > { %v342_v42 = vmax.f32 %v323_v41, 0.0 }
  0xe7   : > { %354 = vst.msk [vmem:[%s533_s27 + $0x48] sm:$0xff] %vm344_vm1, %v342_v42 }
  0xe8 PF: > { %s13_s12 = sadd.s32 1, %s488_s12  }
  0xe9   : > { %p10_p4 = scmp.ge.s32.totalorder %s13_s12, 4  }
  0xeb   :  { %12 = sbr.rel (!%p10_p4) target bundleno = 1 (0x1), region = 62 }

// kernel: encoder_block_forward.2
= control target key start
LH: loop header
LB: loop body
LE: loop exit
PB: predicated region body
PF: predicated region fallthrough
CT: control target
= control target key end

     0   :  { %s1957_s12 = smov 0   ;;  %s1959_s13 = smov 0   ;;  %s2568_s0 = inlined_call_operand.vmem [shape: bf16[2,2,10,18,4], index: 0, kind: input, shape index: {}]   ;;  %s2569_s1 = inlined_call_operand.vmem [shape: bf16[36,8], index: 1, kind: input, shape index: {}]   ;;  %s2570_s2 = inlined_call_operand.vmem [shape: f32[1,8], index: 2, kind: input, shape index: {}]   ;;  %s2571_s3 = inlined_call_operand.vmem [shape: bf16[2,256,8], index: 3, kind: output, shape index: {}]  }
   0x1   :  { %s1961_s14 = smov 0   ;;  %s1963_s15 = smov 0  }
   0x2   :  { %s1965_s16 = smov 0  }
   0x3 LB: > { %s22_s17 = sadd.s32 1, %s1919_s14  ;;  %s25_s18 = sadd.s32 1, %s1923_s15  ;;  %s1927_s16 = sphi %s1965_s16, %s13_s16   ;;  %s1923_s15 = sphi %s1963_s15, %s2575_s15   ;;  %s1919_s14 = sphi %s1961_s14, %s2574_s14   ;;  %s1915_s13 = sphi %s1959_s13, %s2573_s13   ;;  %s1911_s12 = sphi %s1957_s12, %s2572_s12  }
   0x4   : > { %p23_p0 = scmp.ge.s32.totalorder %s22_s17, 2  ;;  %p1536_p1 = scmp.ge.s32.totalorder %s1927_s16, 1 }
   0x5   : > { %p157_p2 = scmp.lt.s32.totalorder %s1927_s16, 5 }
   0x6   : > { %s2577_s17 = smov (%p23_p0, %s22_s17), 0  ;;  %s2579_s18 = smov (!%p23_p0, %s25_s18), %s1923_s15 }
   0x7   : > { %p158_p3 = pnand %p1536_p1, %p157_p2  ;;  %p27_p4 = scmp.ge.s32.totalorder %s2579_s18, 2 }
   0x8   : > { %p189_p5 = scmp.lt.s32.totalorder (!%p158_p3), %s1915_s13, 1  ;;  %p191_p6 = scmp.lt.s32.totalorder (!%p158_p3), %s1911_s12, 1 }
   0x9   : > { %s2581_s18 = smov (%p27_p4, %s2579_s18), 0  ;;  %161 = sbr.rel (%p158_p3) target bundleno = 474 (0x1da), region = 32 }
   0xa   : > { %s1929_s27 = smov (!%p158_p3), 12   ;;  %s1930_s28 = smov (!%p158_p3), 8  }
   0xb   : > { %s1931_s29 = smov (!%p158_p3), 4   ;;  %s1932_s30 = smov (!%p158_p3), 16  }
   0xc   : > { %s1933_s4 = smov (!%p158_p3), 20   ;;  %s1934_s5 = smov (!%p158_p3), 24  }
   0xd   : > { %s1935_s6 = smov (!%p158_p3), 28   ;;  %s1936_s7 = smov (!%p158_p3), 32  }
   0xe   : > { %s2583_s13 = smov (!%p189_p5, %s1915_s13), 1  ;;  %vm508_vm0 = vcmask 1046528   ;;  %vm371_vm1 = vsmask.f32 7424  ;;  %vm1241_vm2 = vcmask 1041408   ;;  %vm1061_vm3 = vcmask 31744  }
   0xf   : > { %s192_s19 = scalar_select %p191_p6, %s1911_s12, 1  ;;  %vm1078_vm4 = vcmask 64512   ;;  %vm1095_vm5 = vcmask 97280   ;;  %vm1112_vm6 = vcmask 130048   ;;  %vm1129_vm7 = vcmask 162816  }
  0x10   : > { %s1765_s20 = smul.u32 60, %s2583_s13  ;;  %vm1146_vm8 = vcmask 195584   ;;  %vm1163_vm9 = vcmask 228352   ;;  %vm1180_vm10 = vcmask 261120   ;;  %vm1224_vm11 = vcmask 293888  }
  0x11   : > { %s1764_s21 = smul.u32 30, %s192_s19  ;;  %vm1422_vm12 = vcmask 60416  }
  0x13   : > { %s195_s22 = sadd.s32 %s1765_s20, %s1764_s21  ;;  %s1538_s21 = sshll.u32 %s1911_s12, 4 }
  0x14   : > { %s1537_s23 = sshll.u32 %s195_s22, 2  ;;  %p201_p7 = scmp.lt.s32.totalorder %s1538_s21, 31 }
  0x15   : > { %s1997_s26 = scalar_lea.vmem %s2568_s0, %s1537_s23  ;;  %s1539_s22 = sshll.u32 %s2583_s13, 5 }
  0x16   : > { %v1549_v0 = vld [vmem:[%s1997_s26 + $0x3c] sm:$0xf]  ;;  %v2001_v1 = vld [vmem:[%s1997_s26 + $0x40] sm:$0xf]  ;;  %v1541_v3 = vld [vmem:[%s1997_s26 + $0xc] sm:$0xf] }
  0x17   : > { %v2004_v2 = vcombine.low %v1549_v0, %v2001_v1  ;;  %v2008_v4 = vld [vmem:[%s1997_s26 + $0x10] sm:$0xf]  ;;  %v218_v6 = vld [vmem:[%s1997_s26 + $0x34] sm:$0xf]  ;;  %v210_v12 = vld [vmem:[%s1997_s26 + $0x4] sm:$0xf] }
  0x18   : > { %v2011_v5 = vcombine.low %v1541_v3, %v2008_v4  ;;  %v237_v7 = vld [vmem:[%s1997_s26 + $0x30] sm:$0xe]  ;;  %v2018_v8 = vld [vmem:[%s1997_s26 + $0x38] ss:$0 sps:$4 sm:$0x11]   ;;  %s2585_s21 = smov (!%p201_p7, %s1538_s21), 31 }
  0x19   : > { %597 = vrot.lane.b32.xlu1 %v2004_v2, %s1929_s27  ;;  %v1625_v9 = vcombine.low %v237_v7, %v218_v6  ;;  %v217_v10 = vld [vmem:[%s1997_s26 + $0x30] sm:$0xf]  ;;  %v680_v11 = vshll.u32 %v2004_v2, 16  ;;  %v522_v14 = vrot.slane %v2018_v8, 1  ;;  %v233_v15 = vld [vmem:[%s1997_s26] sm:$0xe]  ;;  %s204_s23 = sadd.s32 %s1539_s22, %s2585_s21 }
  0x1a   : > { %589 = vrot.lane.b32.xlu0 %v2011_v5, %s1929_s27  ;;  %v209_v16 = vld [vmem:[%s1997_s26] sm:$0xf]  ;;  %v632_v17 = vshll.u32 %v2011_v5, 16  ;;  %v2029_v18 = vcombine.low %v217_v10, %v218_v6  ;;  %v1821_v19 = vld [vmem:[%s1997_s26 + $0x8] ss:$0 sps:$4 sm:$0x11]   ;;  %v1621_v20 = vcombine.low %v233_v15, %v210_v12 }
  0x1b   : > { %v521_v13 = vrot.slane %v1625_v9, 1  ;;  %v219_v21 = vld [vmem:[%s1997_s26 + $0x3c] sm:$0xf]  ;;  %v2034_v23 = vcombine.low %v209_v16, %v210_v12  ;;  %v220_v24 = vld [vmem:[%s1997_s26 + $0x40] sm:$0xf]  ;;  %v510_v27 = vrot.slane %v1821_v19, 1 }
  0x1c   : > { %v238_v25 = vld [vmem:[%s1997_s26 + $0x3c] sm:$0xe]  ;;  %v509_v26 = vrot.slane %v1621_v20, 1  ;;  %v1825_v28 = vld [vmem:[%s1997_s26 + $0x44] ss:$0 sps:$4 sm:$0x11]   ;;  %v2041_v31 = vcombine.low %v219_v21, %v220_v24 }
  0x1d   : > { %v523_v22 = vsel %vm508_vm0, %v521_v13, %v522_v14  ;;  %v1626_v29 = vcombine.low %v238_v25, %v220_v24  ;;  %v421_v30 = vshrl.u32 %v2029_v18, 16  ;;  %v211_v32 = vld [vmem:[%s1997_s26 + $0xc] sm:$0xf]  ;;  %v212_v33 = vld [vmem:[%s1997_s26 + $0x10] sm:$0xf]  ;;  %v525_v36 = vrot.slane %v1825_v28, 1 }
  0x1e   : > { %541 = vrot.lane.b32.xlu1 %v523_v22, %s1930_s28  ;;  %v511_v34 = vsel %vm508_vm0, %v509_v26, %v510_v27  ;;  %v234_v37 = vld [vmem:[%s1997_s26 + $0xc] sm:$0xe]  ;;  %v2047_v38 = vcombine.low %v211_v32, %v212_v33  ;;  %v1828_v39 = vld [vmem:[%s1997_s26 + $0x14] ss:$0 sps:$4 sm:$0x11]   ;;  %v373_v41 = vshrl.u32 %v2034_v23, 16 }
  0x1f   : > { %v524_v35 = vrot.slane %v1626_v29, 1  ;;  %533 = vrot.lane.b32.xlu0 %v511_v34, %s1930_s28  ;;  %v1622_v40 = vcombine.low %v234_v37, %v212_v33  ;;  %v375_v42 = vshll.u32 %v2034_v23, 16  ;;  %v380_v43 = vshll.u32 %v1821_v19, 16  ;;  %v1551_v52 = vld [vmem:[%s1997_s26 + $0x48] sm:$0xf] }
  0x20   : > { %v385_v45 = vshrl.u32 %v2047_v38, 16  ;;  %v387_v46 = vshll.u32 %v2047_v38, 16  ;;  %v433_v47 = vshrl.u32 %v2041_v31, 16  ;;  %v513_v49 = vrot.slane %v1828_v39, 1  ;;  %v2061_v57 = vld [vmem:[%s1997_s26 + $0x4c] sm:$0xf] }
  0x21   : > { %v526_v44 = vsel %vm508_vm0, %v524_v35, %v525_v36  ;;  %v512_v48 = vrot.slane %v1622_v40, 1  ;;  %v392_v50 = vshll.u32 %v1828_v39, 16  ;;  %v377_v51 = vrot.slane %v375_v42, 1  ;;  %v1543_v62 = vld [vmem:[%s1997_s26 + $0x18] sm:$0xf] }
  0x22   : > { %543 = vrot.lane.b32.xlu1 %v526_v44, %s1930_s28  ;;  %v389_v53 = vrot.slane %v387_v46, 1  ;;  %v382_v54 = vrot.slane %v380_v43, 1  ;;  %v435_v55 = vshll.u32 %v2041_v31, 16  ;;  %v440_v56 = vshll.u32 %v1825_v28, 16  ;;  %v2067_v63 = vld [vmem:[%s1997_s26 + $0x1c] sm:$0xf] }
  0x23   : > { %v514_v58 = vsel %vm508_vm0, %v512_v48, %v513_v49  ;;  %v394_v59 = vrot.slane %v392_v50, 1  ;;  %v378_v60 = vor.u32 %v377_v51, %v373_v41  ;;  %v423_v61 = vshll.u32 %v2029_v18, 16  ;;  %v2074_v13 = vld [vmem:[%s1997_s26 + $0x44] ss:$0 sps:$4 sm:$0x11]  }
  0x24   : > { %535 = vrot.lane.b32.xlu0 %v514_v58, %s1930_s28  ;;  %v390_v0 = vor.u32 %v389_v53, %v385_v45  ;;  %v437_v3 = vrot.slane %v435_v55, 1  ;;  %v442_v6 = vrot.slane %v440_v56, 1  ;;  %v428_v7 = vshll.u32 %v2018_v8, 16  ;;  %v2079_v20 = vld [vmem:[%s1997_s26 + $0x14] ss:$0 sps:$4 sm:$0x11]  }
  0x25   : > { %v383_v9 = vsel %vm371_vm1, %v378_v60, %v382_v54  ;;  %v425_v10 = vrot.slane %v423_v61, 1  ;;  %v1634_v12 = vcombine.low %v1551_v52, %v2061_v57  ;;  %v1630_v19 = vcombine.low %v1543_v62, %v2067_v63  ;;  %v2086_v24 = vld [vmem:[%s1997_s26 + $0x50] ss:$0 sps:$4 sm:$0x11]   ;;  %v1569_v35 = vld [vmem:[%s1997_s26 + $0x3c] sm:$0xe] }
  0x26   : > { %v395_v14 = vsel %vm371_vm1, %v390_v0, %v394_v59  ;;  %v438_v15 = vor.u32 %v437_v3, %v433_v47  ;;  %v430_v16 = vrot.slane %v428_v7, 1  ;;  %v678_v21 = vshrl.u32 %v2004_v2, 16  ;;  %v1565_v43 = vld [vmem:[%s1997_s26 + $0xc] sm:$0xe]  ;;  %v1570_v45 = vld [vmem:[%s1997_s26 + $0x48] sm:$0xe] }
  0x27   : > { %470 = vrot.lane.b32.xlu1 %v395_v14, %s1931_s29  ;;  %v426_v8 = vor.u32 %v425_v10, %v421_v30  ;;  %v682_v22 = vrot.slane %v680_v11, 1  ;;  %v692_v26 = vshll.u32 %v1634_v12, 16  ;;  %v685_v27 = vshll.u32 %v2074_v13, 16  ;;  %v2097_v11 = vld [vmem:[%s1997_s26 + $0x20] ss:$0 sps:$4 sm:$0x11]  }
  0x28   : > { %468 = vrot.lane.b32.xlu0 %v383_v9, %s1931_s29  ;;  %v443_v25 = vsel %vm371_vm1, %v438_v15, %v442_v6  ;;  %v630_v28 = vshrl.u32 %v2011_v5, 16  ;;  %v644_v30 = vshll.u32 %v1630_v19, 16  ;;  %v634_v32 = vrot.slane %v632_v17, 1  ;;  %v1566_v50 = vld [vmem:[%s1997_s26 + $0x18] sm:$0xe] }
  0x29   : > { %v431_v29 = vsel %vm371_vm1, %v426_v8, %v430_v16  ;;  %v637_v2 = vshll.u32 %v2079_v20, 16  ;;  %v683_v33 = vor.u32 %v682_v22, %v678_v21  ;;  %v687_v34 = vrot.slane %v685_v27, 1  ;;  %v1581_v55 = vld [vmem:[%s1997_s26 + $0x48] sm:$0xf]  ;;  %v2117_v56 = vld [vmem:[%s1997_s26 + $0x4c] sm:$0xf] }
  0x2a   : > { %v635_v36 = vor.u32 %v634_v32, %v630_v28  ;;  %v690_v37 = vshrl.u32 %v1634_v12, 16  ;;  %v694_v39 = vrot.slane %v692_v26, 1  ;;  %v697_v5 = vshll.u32 %v2086_v24, 16  ;;  %v1573_v3 = vld [vmem:[%s1997_s26 + $0x18] sm:$0xf] }
  0x2b   : > { %478 = vrot.lane.b32.xlu1 %v443_v25, %s1931_s29  ;;  %v639_v17 = vrot.slane %v637_v2, 1  ;;  %v642_v40 = vshrl.u32 %v1630_v19, 16  ;;  %v646_v41 = vrot.slane %v644_v30, 1  ;;  %v649_v42 = vshll.u32 %v2097_v11, 16  ;;  %v2128_v6 = vld [vmem:[%s1997_s26 + $0x1c] sm:$0xf] }
  0x2c   : > { %476 = vrot.lane.b32.xlu0 %v431_v29, %s1931_s29  ;;  %v1649_v44 = vcombine.low %v1569_v35, %v2001_v1  ;;  %v688_v46 = vsel %vm371_vm1, %v683_v33, %v687_v34  ;;  %v695_v47 = vor.u32 %v694_v39, %v690_v37  ;;  %v699_v48 = vrot.slane %v697_v5, 1  ;;  %v1575_v16 = vld [vmem:[%s1997_s26 + $0x24] sm:$0xf]  ;;  %v2148_v21 = vld [vmem:[%s1997_s26 + $0x50] ss:$0 sps:$4 sm:$0x11]  }
  0x2d   : > { %v1645_v49 = vcombine.low %v1565_v43, %v2008_v4  ;;  %v640_v51 = vsel %vm371_vm1, %v635_v36, %v639_v17  ;;  %v647_v52 = vor.u32 %v646_v41, %v642_v40  ;;  %v651_v53 = vrot.slane %v649_v42, 1  ;;  %v2155_v27 = vld [vmem:[%s1997_s26 + $0x20] ss:$0 sps:$4 sm:$0x11]   ;;  %v221_v37 = vld [vmem:[%s1997_s26 + $0x48] sm:$0xf] }
  0x2e   : > { %v777_v1 = vrot.slane %v1649_v44, 1  ;;  %v778_v54 = vrot.slane %v2074_v13, 1  ;;  %v1650_v58 = vcombine.low %v1570_v45, %v2061_v57  ;;  %v1646_v4 = vcombine.low %v1566_v50, %v2067_v63  ;;  %v1583_v63 = vld [vmem:[%s1997_s26 + $0x54] sm:$0xf]  ;;  %v2137_v13 = vld [vmem:[%s1997_s26 + $0x58] sm:$0xf] }
  0x2f   : > { %599 = vrot.lane.b32.xlu1 %v1634_v12, %s1929_s27  ;;  %v700_v59 = vsel %vm371_vm1, %v695_v47, %v699_v48  ;;  %v652_v60 = vsel %vm371_vm1, %v647_v52, %v651_v53  ;;  %v765_v61 = vrot.slane %v1645_v49, 1  ;;  %v766_v62 = vrot.slane %v2079_v20, 1  ;;  %v2164_v34 = vld [vmem:[%s1997_s26 + $0x2c] ss:$0 sps:$4 sm:$0x11]  }
  0x30   : > { %591 = vrot.lane.b32.xlu0 %v1630_v19, %s1929_s27  ;;  %v1657_v0 = vcombine.low %v1581_v55, %v2117_v56  ;;  %v779_v57 = vsel %vm508_vm0, %v777_v1, %v778_v54  ;;  %v780_v7 = vrot.slane %v1650_v58, 1  ;;  %v781_v9 = vrot.slane %v2086_v24, 1  ;;  %v2143_v19 = vld [vmem:[%s1997_s26 + $0x28] sm:$0xf]  ;;  %v2169_v39 = vld [vmem:[%s1997_s26 + $0x4c] sm:$0xf] }
  0x31   : > { %v768_v10 = vrot.slane %v1646_v4, 1  ;;  %v769_v12 = vrot.slane %v2097_v11, 1  ;;  %v767_v14 = vsel %vm508_vm0, %v765_v61, %v766_v62  ;;  %v1653_v15 = vcombine.low %v1573_v3, %v2128_v6  ;;  %v2160_v11 = vld [vmem:[%s1997_s26 + $0x5c] ss:$0 sps:$4 sm:$0x11]  }
  0x32   : > { %v936_v20 = vshll.u32 %v1657_v0, 16  ;;  %v1658_v8 = vcombine.low %v1583_v63, %v2137_v13  ;;  %v782_v22 = vsel %vm508_vm0, %v780_v7, %v781_v9  ;;  %v1654_v24 = vcombine.low %v1575_v16, %v2143_v19  ;;  %v213_v17 = vld [vmem:[%s1997_s26 + $0x18] sm:$0xf]  ;;  %v2173_v40 = vld [vmem:[%s1997_s26 + $0x1c] sm:$0xf] }
  0x33   : > { %733 = vrot.lane.b32.xlu1 %v688_v46, %s1932_s30  ;;  %v770_v25 = vsel %vm508_vm0, %v768_v10, %v769_v12  ;;  %v888_v26 = vshll.u32 %v1653_v15, 16  ;;  %v934_v28 = vshrl.u32 %v1657_v0, 16  ;;  %v941_v32 = vshll.u32 %v2148_v21, 16  ;;  %v1601_v41 = vld [vmem:[%s1997_s26 + $0x48] sm:$0xe] }
  0x34   : > { %725 = vrot.lane.b32.xlu0 %v640_v51, %s1932_s30  ;;  %v938_v29 = vrot.slane %v936_v20, 1  ;;  %v948_v30 = vshll.u32 %v1658_v8, 16  ;;  %v886_v2 = vshrl.u32 %v1653_v15, 16  ;;  %v900_v33 = vshll.u32 %v1654_v24, 16  ;;  %v1597_v46 = vld [vmem:[%s1997_s26 + $0x18] sm:$0xe] }
  0x35   : > { %v890_v35 = vrot.slane %v888_v26, 1  ;;  %v893_v36 = vshll.u32 %v2155_v27, 16  ;;  %v943_v42 = vrot.slane %v941_v32, 1  ;;  %v946_v43 = vshrl.u32 %v1658_v8, 16  ;;  %v215_v9 = vld [vmem:[%s1997_s26 + $0x24] sm:$0xf] }
  0x36   : > { %v939_v5 = vor.u32 %v938_v29, %v934_v28  ;;  %v950_v44 = vrot.slane %v948_v30, 1  ;;  %v953_v45 = vshll.u32 %v2160_v11, 16  ;;  %v898_v47 = vshrl.u32 %v1654_v24, 16  ;;  %v2191_v4 = vld [vmem:[%s1997_s26 + $0x50] ss:$0 sps:$4 sm:$0x11]  }
  0x37   : > { %735 = vrot.lane.b32.xlu1 %v700_v59, %s1932_s30  ;;  %v902_v48 = vrot.slane %v900_v33, 1  ;;  %v905_v49 = vshll.u32 %v2164_v34, 16  ;;  %v2182_v50 = vcombine.low %v221_v37, %v2169_v39  ;;  %v891_v51 = vor.u32 %v890_v35, %v886_v2  ;;  %v2208_v10 = vld [vmem:[%s1997_s26 + $0x28] sm:$0xf]  ;;  %v1602_v12 = vld [vmem:[%s1997_s26 + $0x54] sm:$0xe] }
  0x38   : > { %727 = vrot.lane.b32.xlu0 %v652_v60, %s1932_s30  ;;  %v895_v52 = vrot.slane %v893_v36, 1  ;;  %v2185_v53 = vcombine.low %v213_v17, %v2173_v40  ;;  %v1673_v1 = vcombine.low %v1601_v41, %v2117_v56  ;;  %v1669_v54 = vcombine.low %v1597_v46, %v2128_v6  ;;  %v2197_v56 = vld [vmem:[%s1997_s26 + $0x20] ss:$0 sps:$4 sm:$0x11]   ;;  %v223_v6 = vld [vmem:[%s1997_s26 + $0x54] sm:$0xf] }
  0x39   : > { %v951_v55 = vor.u32 %v950_v44, %v946_v43  ;;  %v955_v58 = vrot.slane %v953_v45, 1  ;;  %v944_v59 = vsel %vm371_vm1, %v939_v5, %v943_v42  ;;  %v903_v60 = vor.u32 %v902_v48, %v898_v47  ;;  %v2233_v36 = vld [vmem:[%s1997_s26 + $0x5c] ss:$0 sps:$4 sm:$0x11]  }
  0x3a   : > { %v907_v61 = vrot.slane %v905_v49, 1  ;;  %v447_v62 = vshll.u32 %v2182_v50, 16  ;;  %v399_v3 = vshll.u32 %v2185_v53, 16  ;;  %v1033_v63 = vrot.slane %v1673_v1, 1 }
  0x3b   : > { %797 = vrot.lane.b32.xlu1 %v779_v57, %s1933_s4  ;;  %v2203_v57 = vld [vmem:[%s1997_s26 + $0x58] sm:$0xf]  ;;  %v1034_v7 = vrot.slane %v2148_v21, 1  ;;  %v1022_v16 = vrot.slane %v2155_v27, 1  ;;  %v452_v20 = vshll.u32 %v2191_v4, 16  ;;  %v397_v26 = vshrl.u32 %v2185_v53, 16 }
  0x3c   : > { %789 = vrot.lane.b32.xlu0 %v767_v14, %s1933_s4  ;;  %v956_v14 = vsel %vm371_vm1, %v951_v55, %v955_v58  ;;  %v908_v21 = vsel %vm371_vm1, %v903_v60, %v907_v61  ;;  %v401_v28 = vrot.slane %v399_v3, 1  ;;  %v404_v27 = vshll.u32 %v2197_v56, 16 }
  0x3d   : > { %v2225_v29 = vcombine.low %v215_v9, %v2208_v10  ;;  %v1674_v30 = vcombine.low %v1602_v12, %v2137_v13  ;;  %v454_v2 = vrot.slane %v452_v20, 1  ;;  %v1035_v33 = vsel %vm508_vm0, %v1033_v63, %v1034_v7  ;;  %v2238_v13 = vld [vmem:[%s1997_s26 + $0x2c] ss:$0 sps:$4 sm:$0x11]   ;;  %v236_v63 = vld [vmem:[%s1997_s26 + $0x24] sm:$0xe] }
  0x3e   : > { %v402_v17 = vor.u32 %v401_v28, %v397_v26  ;;  %v406_v41 = vrot.slane %v404_v27, 1  ;;  %v1037_v43 = vrot.slane %v2160_v11, 1  ;;  %v1025_v45 = vrot.slane %v2164_v34, 1  ;;  %v235_v34 = vld [vmem:[%s1997_s26 + $0x18] sm:$0xe] }
  0x3f   : > { %799 = vrot.lane.b32.xlu1 %v782_v22, %s1933_s4  ;;  %v445_v22 = vshrl.u32 %v2182_v50, 16  ;;  %v1036_v42 = vrot.slane %v1674_v30, 1  ;;  %v464_v49 = vshll.u32 %v2233_v36, 16  ;;  %v409_v1 = vshrl.u32 %v2225_v29, 16  ;;  %v1555_v28 = vld [vmem:[%s1997_s26 + $0x60] sm:$0xf] }
  0x40   : > { %791 = vrot.lane.b32.xlu0 %v770_v25, %s1933_s4  ;;  %v2220_v25 = vcombine.low %v223_v6, %v2203_v57  ;;  %v1623_v61 = vcombine.low %v235_v34, %v2173_v40  ;;  %v240_v6 = vld [vmem:[%s1997_s26 + $0x54] sm:$0xe]  ;;  %v528_v7 = vrot.slane %v2191_v4, 1  ;;  %v516_v9 = vrot.slane %v2197_v56, 1  ;;  %v1545_v56 = vld [vmem:[%s1997_s26 + $0x24] sm:$0xf] }
  0x41   : > { %v1038_v55 = vsel %vm508_vm0, %v1036_v42, %v1037_v43  ;;  %v1624_v4 = vcombine.low %v236_v63, %v2208_v10  ;;  %v2285_v10 = vld [vmem:[%s1997_s26 + $0x64] sm:$0xf]  ;;  %v2306_v42 = vld [vmem:[%s1997_s26 + $0x2c] ss:$0 sps:$4 sm:$0x11]  }
  0x42   : > { %v459_v37 = vshll.u32 %v2220_v25, 16  ;;  %v457_v47 = vshrl.u32 %v2220_v25, 16  ;;  %v515_v40 = vrot.slane %v1623_v61, 1  ;;  %v1887_v43 = vld [vmem:[%s2569_s1 + $0x8] sm:$0xff]   ;;  %v1888_v34 = vld [vmem:[%s2569_s1] sm:$0xff]  }
  0x43   : > { %853 = vrot.lane.b32.xlu1 %v1657_v0, %s1934_s5  ;;  %v896_v0 = vsel %vm371_vm1, %v891_v51, %v895_v52  ;;  %v239_v51 = vld [vmem:[%s1997_s26 + $0x48] sm:$0xe]  ;;  %v407_v52 = vsel %vm371_vm1, %v402_v17, %v406_v41  ;;  %v518_v30 = vrot.slane %v1624_v4, 1  ;;  %v2301_v41 = vld [vmem:[%s1997_s26 + $0x5c] ss:$0 sps:$4 sm:$0x11]  }
  0x44   : > { %845 = vrot.lane.b32.xlu0 %v1653_v15, %s1934_s5  ;;  %v1021_v15 = vrot.slane %v1669_v54, 1  ;;  %v461_v48 = vrot.slane %v459_v37, 1  ;;  %v416_v54 = vshll.u32 %v2238_v13, 16  ;;  %v1627_v60 = vcombine.low %v239_v51, %v2169_v39  ;;  %v1886_v37 = vld [vmem:[%s2569_s1 + $0x10] ss:$0 sps:$4 sm:$0x33]  }
  0x45   : > { %v517_v27 = vsel %vm508_vm0, %v515_v40, %v516_v9  ;;  %1762 = vmatprep.subr.msk.bf16.mxu0 %vm1241_vm2, %v1886_v37  ;;  %1763 = vmatprep.subr.msk.bf16.mxu1 %vm1241_vm2, %v1886_v37  ;;  %v1567_v9 = vld [vmem:[%s1997_s26 + $0x24] sm:$0xe] }
  0x46   : > { %v1023_v5 = vsel %vm508_vm0, %v1021_v15, %v1022_v16  ;;  %v462_v58 = vor.u32 %v461_v48, %v457_v47  ;;  %v418_v3 = vrot.slane %v416_v54, 1  ;;  %v527_v12 = vrot.slane %v1627_v60, 1  ;;  %v1553_v15 = vld [vmem:[%s1997_s26 + $0x54] sm:$0xf]  ;;  %v2269_v16 = vld [vmem:[%s1997_s26 + $0x58] sm:$0xf] }
  0x47   : > { %855 = vrot.lane.b32.xlu1 %v1658_v8, %s1934_s5  ;;  %v1598_v8 = vld [vmem:[%s1997_s26 + $0x24] sm:$0xe]  ;;  %v1243_v47 = vsel %vm1241_vm2, %v1886_v37, 0  ;;  %v709_v48 = vshll.u32 %v2301_v41, 16 }
  0x48   : > { %847 = vrot.lane.b32.xlu0 %v1654_v24, %s1934_s5  ;;  %v449_v24 = vrot.slane %v447_v62, 1  ;;  %v1670_v32 = vcombine.low %v1598_v8, %v2143_v19  ;;  %v411_v19 = vshll.u32 %v2225_v29, 16  ;;  %v2275_v8 = vld [vmem:[%s1997_s26 + $0x28] sm:$0xf]  ;;  %1735 = vmatpush3.bf16.msra.mxu0 %v1243_v47 }
  0x49   : > { %v1631_v26 = vcombine.low %v1545_v56, %v2275_v8  ;;  %v2319_v54 = vld [vmem:[%s1997_s26 + $0x38] ss:$0 sps:$4 sm:$0x11]   ;;  %1759 = vmatpush3.bf16.msra.mxu1 %v1243_v47  ;;  %1736 = vmatprep.subr.bf16.mxu0 %v1887_v43 }
  0x4a   : > { %v450_v35 = vor.u32 %v449_v24, %v445_v22  ;;  %v1024_v44 = vrot.slane %v1670_v32, 1  ;;  %v413_v11 = vrot.slane %v411_v19, 1  ;;  %v531_v24 = vrot.slane %v2233_v36, 1  ;;  %1757 = vmatprep.subr.bf16.mxu1 %v1887_v43 }
  0x4b   : > { %989 = vrot.lane.b32.xlu1 %v944_v59, %s1935_s6  ;;  %v466_v59 = vrot.slane %v464_v49, 1  ;;  %v519_v32 = vrot.slane %v2238_v13, 1  ;;  %v1636_v36 = vcombine.low %v1555_v28, %v2285_v10  ;;  %v656_v17 = vshll.u32 %v1631_v26, 16  ;;  %v2345_v28 = vld [vmem:[%s1997_s26 + $0x64] sm:$0xf] }
  0x4c   : > { %981 = vrot.lane.b32.xlu0 %v896_v0, %s1935_s6  ;;  %v455_v46 = vsel %vm371_vm1, %v450_v35, %v454_v2  ;;  %v1026_v62 = vsel %vm508_vm0, %v1024_v44, %v1025_v45  ;;  %v414_v0 = vor.u32 %v413_v11, %v409_v1  ;;  %v1547_v2 = vld [vmem:[%s1997_s26 + $0x30] sm:$0xf]  ;;  %v654_v49 = vshrl.u32 %v1631_v26, 16  ;;  %1737 = vmatpush3.bf16.msra.mxu0 %v1887_v43 }
  0x4d   : > { %v467_v39 = vsel %vm371_vm1, %v462_v58, %v466_v59  ;;  %v520_v13 = vsel %vm508_vm0, %v518_v30, %v519_v32  ;;  %v716_v44 = vshll.u32 %v1636_v36, 16  ;;  %v658_v51 = vrot.slane %v656_v17, 1  ;;  %1760 = vmatpush3.bf16.msra.mxu1 %v1887_v43  ;;  %1738 = vmatprep.subr.bf16.mxu0 %v1888_v34 }
  0x4e   : > { %v419_v20 = vsel %vm371_vm1, %v414_v0, %v418_v3  ;;  %v661_v11 = vshll.u32 %v2306_v42, 16  ;;  %v714_v58 = vshrl.u32 %v1636_v36, 16  ;;  %v711_v59 = vrot.slane %v709_v48, 1  ;;  %v1571_v0 = vld [vmem:[%s1997_s26 + $0x54] sm:$0xe]  ;;  %1758 = vmatprep.subr.bf16.mxu1 %v1888_v34 }
  0x4f   : > { %991 = vrot.lane.b32.xlu1 %v956_v14, %s1935_s6  ;;  %v1628_v14 = vcombine.low %v240_v6, %v2203_v57  ;;  %v529_v57 = vsel %vm508_vm0, %v527_v12, %v528_v7  ;;  %v659_v60 = vor.u32 %v658_v51, %v654_v49  ;;  %v718_v61 = vrot.slane %v716_v44, 1  ;;  %v1579_v44 = vld [vmem:[%s1997_s26 + $0x3c] sm:$0xf]  ;;  %v1882_v51 = vld [vmem:[%s1997_s26 + $0x68] ss:$0 sps:$4 sm:$0x11]  }
  0x50   : > { %983 = vrot.lane.b32.xlu0 %v908_v21, %s1935_s6  ;;  %v1635_v21 = vcombine.low %v1553_v15, %v2269_v16  ;;  %v663_v3 = vrot.slane %v661_v11, 1  ;;  %v673_v7 = vshll.u32 %v2319_v54, 16  ;;  %v1647_v15 = vcombine.low %v1567_v9, %v2275_v8  ;;  %1739 = vmatpush3.bf16.msra.mxu0 %v1888_v34  ;;  %v1883_v11 = vld [vmem:[%s1997_s26 + $0x38] ss:$0 sps:$4 sm:$0x11]  }
  0x51   : > { %v530_v22 = vrot.slane %v1628_v14, 1  ;;  %v719_v40 = vor.u32 %v718_v61, %v714_v58  ;;  %1761 = vmatpush3.bf16.msra.mxu1 %v1888_v34  ;;  %v784_v8 = vrot.slane %v2301_v41, 1  ;;  %v1587_v41 = vld [vmem:[%s1997_s26 + $0x6c] sm:$0xf]  ;;  %v775_v43 = vrot.slane %v2319_v54, 1 }
  0x52   : > { %v704_v35 = vshll.u32 %v1635_v21, 16  ;;  %v702_v45 = vshrl.u32 %v1635_v21, 16  ;;  %v664_v4 = vsel %vm371_vm1, %v659_v60, %v663_v3  ;;  %v771_v32 = vrot.slane %v1647_v15, 1  ;;  %v1884_v61 = vld [vmem:[%s1997_s26 + $0x74] ss:$0 sps:$4 sm:$0x11]  }
  0x53   : > { %1053 = vrot.lane.b32.xlu1 %v1035_v33, %s1936_s7  ;;  %v2291_v33 = vld [vmem:[%s1997_s26 + $0x34] sm:$0xf]  ;;  %v965_v58 = vshll.u32 %v1882_v51, 16  ;;  %v1885_v3 = vld [vmem:[%s1997_s26 + $0x44] ss:$0 sps:$4 sm:$0x11]  }
  0x54   : > { %1045 = vrot.lane.b32.xlu0 %v1023_v5, %s1936_s7  ;;  %v532_v5 = vsel %vm508_vm0, %v530_v22, %v531_v24  ;;  %v1632_v19 = vcombine.low %v1547_v2, %v2291_v33  ;;  %v1577_v2 = vld [vmem:[%s1997_s26 + $0x30] sm:$0xf] }
  0x56   : > { %v668_v1 = vshll.u32 %v1632_v19, 16  ;;  %v666_v6 = vshrl.u32 %v1632_v19, 16 }
  0x57   : > { %480 = vrot.lane.b32.xlu1 %v455_v46, %s1931_s29  ;;  %v706_v46 = vrot.slane %v704_v35, 1  ;;  %v2352_v35 = vld [vmem:[%s1997_s26 + $0x34] sm:$0xf] }
  0x58   : > { %472 = vrot.lane.b32.xlu0 %v407_v52, %s1931_s29  ;;  %v2315_v52 = vld [vmem:[%s1997_s26 + $0x68] ss:$0 sps:$4 sm:$0x11]   ;;  %v670_v63 = vrot.slane %v668_v1, 1  ;;  %v1655_v17 = vcombine.low %v1577_v2, %v2352_v35 }
  0x5a   : > { %v671_v56 = vor.u32 %v670_v63, %v666_v6  ;;  %v912_v49 = vshll.u32 %v1655_v17, 16 }
  0x5b   : > { %1055 = vrot.lane.b32.xlu1 %v1038_v55, %s1936_s7  ;;  %v707_v55 = vor.u32 %v706_v46, %v702_v45  ;;  %v2368_v45 = vld [vmem:[%s1997_s26 + $0x40] sm:$0xf] }
  0x5c   : > { %1047 = vrot.lane.b32.xlu0 %v1026_v62, %s1936_s7  ;;  %v721_v62 = vshll.u32 %v2315_v52, 16  ;;  %v1656_v1 = vcombine.low %v1579_v44, %v2368_v45  ;;  %v914_v60 = vrot.slane %v912_v49, 1 }
  0x5d   : > { %v712_v12 = vsel %vm371_vm1, %v707_v55, %v711_v59  ;;  %v910_v59 = vshrl.u32 %v1655_v17, 16 }
  0x5e   : > { %v723_v14 = vrot.slane %v721_v62, 1  ;;  %v924_v62 = vshll.u32 %v1656_v1, 16  ;;  %v922_v15 = vshrl.u32 %v1656_v1, 16 }
  0x5f   : > { %482 = vrot.lane.b32.xlu1 %v467_v39, %s1931_s29  ;;  %v1651_v39 = vcombine.low %v1571_v0, %v2269_v16  ;;  %v1568_v16 = vld [vmem:[%s1997_s26 + $0x30] sm:$0xe]  ;;  %v917_v0 = vshll.u32 %v1883_v11, 16  ;;  %v915_v9 = vor.u32 %v914_v60, %v910_v59 }
  0x60   : > { %474 = vrot.lane.b32.xlu0 %v419_v20, %s1931_s29  ;;  %v1572_v20 = vld [vmem:[%s1997_s26 + $0x60] sm:$0xe]  ;;  %v724_v22 = vsel %vm371_vm1, %v719_v40, %v723_v14 }
  0x61   : > { %v783_v24 = vrot.slane %v1651_v39, 1  ;;  %v1603_v40 = vld [vmem:[%s1997_s26 + $0x60] sm:$0xe]  ;;  %v919_v14 = vrot.slane %v917_v0, 1 }
  0x63   : > { %545 = vrot.lane.b32.xlu1 %v529_v57, %s1930_s28  ;;  %v1652_v57 = vcombine.low %v1572_v20, %v2285_v10  ;;  %v772_v10 = vrot.slane %v2306_v42, 1  ;;  %v785_v37 = vsel %vm508_vm0, %v783_v24, %v784_v8  ;;  %v926_v20 = vrot.slane %v924_v62, 1  ;;  %v1604_v8 = vld [vmem:[%s1997_s26 + $0x6c] sm:$0xe] }
  0x64   : > { %537 = vrot.lane.b32.xlu0 %v517_v27, %s1930_s28  ;;  %v1648_v27 = vcombine.low %v1568_v16, %v2291_v33  ;;  %v787_v33 = vrot.slane %v2315_v52, 1 }
  0x66   : > { %v774_v42 = vrot.slane %v1648_v27, 1 }
  0x67   : > { %547 = vrot.lane.b32.xlu1 %v532_v5, %s1930_s28  ;;  %v786_v5 = vrot.slane %v1652_v57, 1 }
  0x68   : > { %539 = vrot.lane.b32.xlu0 %v520_v13, %s1930_s28  ;;  %v2362_v13 = vld [vmem:[%s1997_s26 + $0x70] sm:$0xf]  ;;  %v776_v52 = vsel %vm508_vm0, %v774_v42, %v775_v43  ;;  %v1043_v43 = vrot.slane %v1884_v61, 1 }
  0x69   : > { %v1660_v47 = vcombine.low %v1587_v41, %v2362_v13  ;;  %v788_v48 = vsel %vm508_vm0, %v786_v5, %v787_v33  ;;  %v1040_v5 = vrot.slane %v1882_v51, 1  ;;  %v1028_v41 = vrot.slane %v1883_v11, 1 }
  0x6b   : > { %601 = vrot.lane.b32.xlu1 %v1635_v21, %s1929_s27  ;;  %v675_v21 = vrot.slane %v673_v7, 1  ;;  %v972_v54 = vshll.u32 %v1660_v47, 16  ;;  %v970_v63 = vshrl.u32 %v1660_v47, 16  ;;  %v967_v7 = vrot.slane %v965_v58, 1 }
  0x6c   : > { %593 = vrot.lane.b32.xlu0 %v1631_v26, %s1929_s27  ;;  %v1585_v26 = vld [vmem:[%s1997_s26 + $0x60] sm:$0xf] }
  0x6d   : > { %v676_v30 = vsel %vm371_vm1, %v671_v56, %v675_v21  ;;  %v974_v39 = vrot.slane %v972_v54, 1  ;;  %v1599_v56 = vld [vmem:[%s1997_s26 + $0x30] sm:$0xe]  ;;  %v1675_v21 = vcombine.low %v1603_v40, %v2345_v28 }
  0x6e   : > { %v1671_v24 = vcombine.low %v1599_v56, %v2352_v35 }
  0x6f   : > { %603 = vrot.lane.b32.xlu1 %v1636_v36, %s1929_s27  ;;  %v1659_v36 = vcombine.low %v1585_v26, %v2345_v28  ;;  %v975_v57 = vor.u32 %v974_v39, %v970_v63  ;;  %v920_v26 = vsel %vm371_vm1, %v915_v9, %v919_v14  ;;  %v1676_v28 = vcombine.low %v1604_v8, %v2362_v13 }
  0x70   : > { %595 = vrot.lane.b32.xlu0 %v1632_v19, %s1929_s27  ;;  %v773_v19 = vsel %vm508_vm0, %v771_v32, %v772_v10  ;;  %v1600_v10 = vld [vmem:[%s1997_s26 + $0x3c] sm:$0xe]  ;;  %s1540_s26 = sshll.u32 %s204_s23, 2 }
  0x71   : > { %v960_v46 = vshll.u32 %v1659_v36, 16  ;;  %v958_v34 = vshrl.u32 %v1659_v36, 16  ;;  %v1672_v35 = vcombine.low %v1600_v10, %v2368_v45  ;;  %v1042_v13 = vrot.slane %v1676_v28, 1  ;;  %s2506_s27 = scalar_lea.vmem %s2571_s3, %s1540_s26 }
  0x73   : > { %737 = vrot.lane.b32.xlu1 %v712_v12, %s1932_s30  ;;  %v962_v55 = vrot.slane %v960_v46, 1  ;;  %v977_v12 = vshll.u32 %v1884_v61, 16  ;;  %v1044_v49 = vsel %vm508_vm0, %v1042_v13, %v1043_v43 }
  0x74   : > { %729 = vrot.lane.b32.xlu0 %v664_v4, %s1932_s30  ;;  %v929_v4 = vshll.u32 %v1885_v3, 16 }
  0x75   : > { %v963_v6 = vor.u32 %v962_v55, %v958_v34 }
  0x76   : > { %v931_v32 = vrot.slane %v929_v4, 1 }
  0x77   : > { %739 = vrot.lane.b32.xlu1 %v724_v22, %s1932_s30  ;;  %v968_v16 = vsel %vm371_vm1, %v963_v6, %v967_v7  ;;  %v979_v22 = vrot.slane %v977_v12, 1 }
  0x78   : > { %731 = vrot.lane.b32.xlu0 %v676_v30, %s1932_s30  ;;  %v927_v30 = vor.u32 %v926_v20, %v922_v15 }
  0x7a   : > { %v932_v33 = vsel %vm371_vm1, %v927_v30, %v931_v32 }
  0x7b   : > { %801 = vrot.lane.b32.xlu1 %v785_v37, %s1933_s4  ;;  %v1039_v37 = vrot.slane %v1675_v21, 1 }
  0x7c   : > { %793 = vrot.lane.b32.xlu0 %v773_v19, %s1933_s4 }
  0x7d   : > { %v1041_v42 = vsel %vm508_vm0, %v1039_v37, %v1040_v5 }
  0x7f   : > { %803 = vrot.lane.b32.xlu1 %v788_v48, %s1933_s4  ;;  %v1031_v48 = vrot.slane %v1885_v3, 1 }
  0x80   : > { %795 = vrot.lane.b32.xlu0 %v776_v52, %s1933_s4 }
  0x83   : > { %857 = vrot.lane.b32.xlu1 %v1659_v36, %s1934_s5  ;;  %v980_v36 = vsel %vm371_vm1, %v975_v57, %v979_v22 }
  0x84   : > { %849 = vrot.lane.b32.xlu0 %v1655_v17, %s1934_s5  ;;  %v1027_v17 = vrot.slane %v1671_v24, 1 }
  0x86   : > { %v1029_v46 = vsel %vm508_vm0, %v1027_v17, %v1028_v41 }
  0x87   : > { %859 = vrot.lane.b32.xlu1 %v1660_v47, %s1934_s5  ;;  %v1030_v47 = vrot.slane %v1672_v35, 1 }
  0x88   : > { %851 = vrot.lane.b32.xlu0 %v1656_v1, %s1934_s5 }
  0x89   : > { %v1032_v51 = vsel %vm508_vm0, %v1030_v47, %v1031_v48 }
  0x8b   : > { %v2393_v27 = vpop.permute.xlu1 %597  ;;  %993 = vrot.lane.b32.xlu1 %v968_v16, %s1935_s6 }
  0x8c   : > { %v590_v2 = vpop.permute.xlu0 %589  ;;  %985 = vrot.lane.b32.xlu0 %v920_v26, %s1935_s6 }
  0x8f   : > { %995 = vrot.lane.b32.xlu1 %v980_v36, %s1935_s6 }
  0x90   : > { %v542_v19 = vpop.permute.xlu1 %541  ;;  %987 = vrot.lane.b32.xlu0 %v932_v33, %s1935_s6 }
  0x91   : > { %v534_v44 = vpop.permute.xlu0 %533 }
  0x93   : > { %1057 = vrot.lane.b32.xlu1 %v1041_v42, %s1936_s7 }
  0x94   : > { %v544_v45 = vpop.permute.xlu1 %543  ;;  %1049 = vrot.lane.b32.xlu0 %v1029_v46, %s1936_s7 }
  0x96   : > { %v536_v52 = vpop.permute.xlu0 %535 }
  0x97   : > { %1059 = vrot.lane.b32.xlu1 %v1044_v49, %s1936_s7 }
  0x98   : > { %1051 = vrot.lane.b32.xlu0 %v1032_v51, %s1936_s7 }
  0x99   : > { %v471_v1 = vpop.permute.xlu1 %470 }
  0x9a   : > { %v469_v11 = vpop.permute.xlu0 %468 }
  0x9b   : > { %v1063_v14 = vsel %vm1061_vm3, %v2034_v23, %v469_v11 }
  0x9c   : > { %v1080_v56 = vsel %vm1078_vm4, %v1063_v14, %v534_v44 }
  0x9d   : > { %v479_v54 = vpop.permute.xlu1 %478  ;;  %v1097_v57 = vsel %vm1095_vm5, %v1080_v56, %v590_v2  ;;  %v1065_v2 = vsel %vm1061_vm3, %v2047_v38, %v471_v1 }
  0x9e   : > { %v477_v34 = vpop.permute.xlu0 %476  ;;  %v1082_v33 = vsel %vm1078_vm4, %v1065_v2, %v536_v52 }
  0x9f   : > { %v1071_v40 = vsel %vm1061_vm3, %v2029_v18, %v477_v34 }
  0xa0   : > { %v1088_v20 = vsel %vm1078_vm4, %v1071_v40, %v542_v19 }
  0xa1   : > { %v600_v55 = vpop.permute.xlu1 %599  ;;  %v1105_v21 = vsel %vm1095_vm5, %v1088_v20, %v2393_v27  ;;  %v1073_v27 = vsel %vm1061_vm3, %v2041_v31, %v479_v54 }
  0xa2   : > { %v592_v58 = vpop.permute.xlu0 %591  ;;  %v1090_v35 = vsel %vm1078_vm4, %v1073_v27, %v544_v45 }
  0xa3   : > { %v1107_v31 = vsel %vm1095_vm5, %v1090_v35, %v600_v55  ;;  %v1099_v38 = vsel %vm1095_vm5, %v1082_v33, %v592_v58 }
  0xa5   : > { %v734_v59 = vpop.permute.xlu1 %733 }
  0xa6   : > { %v726_v60 = vpop.permute.xlu0 %725  ;;  %v1122_v18 = vsel %vm1112_vm6, %v1105_v21, %v734_v59 }
  0xa7   : > { %v1114_v22 = vsel %vm1112_vm6, %v1097_v57, %v726_v60 }
  0xa9   : > { %v736_v61 = vpop.permute.xlu1 %735 }
  0xaa   : > { %v728_v62 = vpop.permute.xlu0 %727  ;;  %v1124_v41 = vsel %vm1112_vm6, %v1107_v31, %v736_v61 }
  0xab   : > { %v1116_v42 = vsel %vm1112_vm6, %v1099_v38, %v728_v62 }
  0xad   : > { %v798_v0 = vpop.permute.xlu1 %797 }
  0xae   : > { %v790_v3 = vpop.permute.xlu0 %789  ;;  %v1139_v24 = vsel %vm1129_vm7, %v1122_v18, %v798_v0 }
  0xaf   : > { %v1131_v8 = vsel %vm1129_vm7, %v1114_v22, %v790_v3 }
  0xb1   : > { %v800_v6 = vpop.permute.xlu1 %799 }
  0xb2   : > { %v792_v63 = vpop.permute.xlu0 %791  ;;  %v1141_v13 = vsel %vm1129_vm7, %v1124_v41, %v800_v6 }
  0xb3   : > { %v1133_v43 = vsel %vm1129_vm7, %v1116_v42, %v792_v63 }
  0xb5   : > { %v854_v7 = vpop.permute.xlu1 %853 }
  0xb6   : > { %v846_v9 = vpop.permute.xlu0 %845  ;;  %v1156_v26 = vsel %vm1146_vm8, %v1139_v24, %v854_v7 }
  0xb7   : > { %v1148_v30 = vsel %vm1146_vm8, %v1131_v8, %v846_v9 }
  0xb9   : > { %v856_v39 = vpop.permute.xlu1 %855 }
  0xba   : > { %v848_v12 = vpop.permute.xlu0 %847  ;;  %v1158_v44 = vsel %vm1146_vm8, %v1141_v13, %v856_v39 }
  0xbb   : > { %v1150_v46 = vsel %vm1146_vm8, %v1133_v43, %v848_v12 }
  0xbd   : > { %v990_v15 = vpop.permute.xlu1 %989 }
  0xbe   : > { %v982_v4 = vpop.permute.xlu0 %981  ;;  %v1173_v32 = vsel %vm1163_vm9, %v1156_v26, %v990_v15 }
  0xbf   : > { %v1165_v28 = vsel %vm1163_vm9, %v1148_v30, %v982_v4 }
  0xc1   : > { %v992_v16 = vpop.permute.xlu1 %991 }
  0xc2   : > { %v984_v23 = vpop.permute.xlu0 %983  ;;  %v1175_v47 = vsel %vm1163_vm9, %v1158_v44, %v992_v16 }
  0xc3   : > { %v1167_v45 = vsel %vm1163_vm9, %v1150_v46, %v984_v23 }
  0xc5   : > { %v1054_v10 = vpop.permute.xlu1 %1053 }
  0xc6   : > { %v1046_v36 = vpop.permute.xlu0 %1045  ;;  %v1190_v37 = vsel %vm1180_vm10, %v1173_v32, %v1054_v10 }
  0xc7   : > { %v1182_v5 = vsel %vm1180_vm10, %v1165_v28, %v1046_v36  ;;  %1748 = vmatprep.mubr.msk.bf16.mxu1 %vm1224_vm11, %v1190_v37 }
  0xc8   : > { %1740 = vmatprep.mubr.msk.bf16.mxu0 %vm1224_vm11, %v1182_v5 }
  0xc9   : > { %v481_v17 = vpop.permute.xlu1 %480 }
  0xca   : > { %v473_v19 = vpop.permute.xlu0 %472  ;;  %v1075_v54 = vsel %vm1061_vm3, %v2182_v50, %v481_v17 }
  0xcb   : > { %v1067_v55 = vsel %vm1061_vm3, %v2185_v53, %v473_v19 }
  0xcd   : > { %v1056_v48 = vpop.permute.xlu1 %1055 }
  0xce   : > { %v1192_v49 = vsel %vm1180_vm10, %v1175_v47, %v1056_v48  ;;  %v1048_v51 = vpop.permute.xlu0 %1047 }
  0xcf   : > { %v1184_v52 = vsel %vm1180_vm10, %v1167_v45, %v1048_v51  ;;  %1749 = vmatmul.mubr.msk.bf16.vlgmr.msra.gmra.mxu1 %vm1224_vm11, %v1192_v49  ;;  %v2498_v51 = vld [vmem:[%s2570_s2] ss:$0 sm:$0xff] }
  0xd0   : > { %1741 = vmatmul.mubr.msk.bf16.vlgmr.msra.gmra.mxu0 %vm1224_vm11, %v1184_v52 }
  0xd1   : > { %v483_v1 = vpop.permute.xlu1 %482 }
  0xd2   : > { %v475_v11 = vpop.permute.xlu0 %474  ;;  %v1077_v61 = vsel %vm1061_vm3, %v2220_v25, %v483_v1 }
  0xd3   : > { %v1069_v0 = vsel %vm1061_vm3, %v2225_v29, %v475_v11 }
  0xd5   : > { %v546_v34 = vpop.permute.xlu1 %545 }
  0xd6   : > { %v1092_v58 = vsel %vm1078_vm4, %v1075_v54, %v546_v34  ;;  %v538_v59 = vpop.permute.xlu0 %537 }
  0xd7   : > { %v1084_v60 = vsel %vm1078_vm4, %v1067_v55, %v538_v59 }
  0xd9   : > { %v548_v62 = vpop.permute.xlu1 %547 }
  0xda   : > { %v1094_v3 = vsel %vm1078_vm4, %v1077_v61, %v548_v62  ;;  %v540_v6 = vpop.permute.xlu0 %539 }
  0xdb   : > { %v1086_v50 = vsel %vm1078_vm4, %v1069_v0, %v540_v6 }
  0xdd   : > { %v602_v63 = vpop.permute.xlu1 %601 }
  0xde   : > { %v594_v7 = vpop.permute.xlu0 %593  ;;  %v1109_v23 = vsel %vm1095_vm5, %v1092_v58, %v602_v63 }
  0xdf   : > { %v1101_v24 = vsel %vm1095_vm5, %v1084_v60, %v594_v7 }
  0xe1   : > { %v604_v53 = vpop.permute.xlu1 %603 }
  0xe2   : > { %v596_v9 = vpop.permute.xlu0 %595  ;;  %v1111_v2 = vsel %vm1095_vm5, %v1094_v3, %v604_v53 }
  0xe3   : > { %v1103_v5 = vsel %vm1095_vm5, %v1086_v50, %v596_v9 }
  0xe5   : > { %v738_v39 = vpop.permute.xlu1 %737 }
  0xe6   : > { %v730_v12 = vpop.permute.xlu0 %729  ;;  %v1126_v8 = vsel %vm1112_vm6, %v1109_v23, %v738_v39 }
  0xe7   : > { %v1118_v27 = vsel %vm1112_vm6, %v1101_v24, %v730_v12 }
  0xe9   : > { %v740_v40 = vpop.permute.xlu1 %739 }
  0xea   : > { %v732_v14 = vpop.permute.xlu0 %731  ;;  %v1128_v35 = vsel %vm1112_vm6, %v1111_v2, %v740_v40 }
  0xeb   : > { %v1120_v38 = vsel %vm1112_vm6, %v1103_v5, %v732_v14 }
  0xed   : > { %v802_v15 = vpop.permute.xlu1 %801 }
  0xee   : > { %v794_v20 = vpop.permute.xlu0 %793  ;;  %v1143_v30 = vsel %vm1129_vm7, %v1126_v8, %v802_v15 }
  0xef   : > { %v1135_v32 = vsel %vm1129_vm7, %v1118_v27, %v794_v20 }
  0xf1   : > { %v804_v25 = vpop.permute.xlu1 %803 }
  0xf2   : > { %v796_v4 = vpop.permute.xlu0 %795  ;;  %v1145_v41 = vsel %vm1129_vm7, %v1128_v35, %v804_v25 }
  0xf3   : > { %v1137_v42 = vsel %vm1129_vm7, %v1120_v38, %v796_v4 }
  0xf5   : > { %v858_v56 = vpop.permute.xlu1 %857 }
  0xf6   : > { %v850_v21 = vpop.permute.xlu0 %849  ;;  %v1160_v10 = vsel %vm1146_vm8, %v1143_v30, %v858_v56 }
  0xf7   : > { %v1152_v28 = vsel %vm1146_vm8, %v1135_v32, %v850_v21 }
  0xf9   : > { %v860_v29 = vpop.permute.xlu1 %859 }
  0xfa   : > { %v852_v16 = vpop.permute.xlu0 %851  ;;  %v1162_v13 = vsel %vm1146_vm8, %v1145_v41, %v860_v29 }
  0xfb   : > { %v1154_v43 = vsel %vm1146_vm8, %v1137_v42, %v852_v16 }
  0xfd   : > { %v994_v18 = vpop.permute.xlu1 %993 }
  0xfe   : > { %v986_v57 = vpop.permute.xlu0 %985  ;;  %v1177_v36 = vsel %vm1163_vm9, %v1160_v10, %v994_v18 }
  0xff   : > { %v1169_v31 = vsel %vm1163_vm9, %v1152_v28, %v986_v57 }
 0x101   : > { %v996_v22 = vpop.permute.xlu1 %995 }
 0x102   : > { %v988_v26 = vpop.permute.xlu0 %987  ;;  %v1179_v44 = vsel %vm1163_vm9, %v1162_v13, %v996_v22 }
 0x103   : > { %v1171_v47 = vsel %vm1163_vm9, %v1154_v43, %v988_v26 }
 0x105   : > { %v1058_v37 = vpop.permute.xlu1 %1057 }
 0x106   : > { %v1194_v33 = vsel %vm1180_vm10, %v1177_v36, %v1058_v37  ;;  %v1050_v17 = vpop.permute.xlu0 %1049 }
 0x107   : > { %v1186_v19 = vsel %vm1180_vm10, %v1169_v31, %v1050_v17  ;;  %1752 = vmatprep.mubr.msk.bf16.mxu1 %vm1224_vm11, %v1194_v33 }
 0x108   : > { %1744 = vmatprep.mubr.msk.bf16.mxu0 %vm1224_vm11, %v1186_v19 }
 0x109   : > { %v1060_v46 = vpop.permute.xlu1 %1059 }
 0x10a   : > { %v1196_v48 = vsel %vm1180_vm10, %v1179_v44, %v1060_v46  ;;  %v1052_v45 = vpop.permute.xlu0 %1051 }
 0x10b   : > { %v1188_v49 = vsel %vm1180_vm10, %v1171_v47, %v1052_v45  ;;  %1753 = vmatmul.mubr.msk.bf16.gmra.mxu1 %vm1224_vm11, %v1196_v48 }
 0x10c   : > { %1745 = vmatmul.mubr.msk.bf16.gmra.mxu0 %vm1224_vm11, %v1188_v49 }
 0x18f   : > { %v1750_v52 = vpop.f32.mrf.mxu1 }
 0x190   : > { %v1742_v1 = vpop.f32.mrf.mxu0  ;;  %v1320_v11 = vadd.f32 %v1750_v52, %v2498_v51 }
 0x191   : > { %v1288_v54 = vadd.f32 %v1742_v1, %v2498_v51  ;;  %v1311_v34 = vpop.f32.mrf.mxu1 }
 0x192   : > { %v1352_v55 = vmax.f32 %v1320_v11, 0.0  ;;  %v1279_v58 = vpop.f32.mrf.mxu0  ;;  %v1312_v59 = vadd.f32 %v2498_v51, %v1311_v34 }
 0x193   : > { %v1344_v60 = vmax.f32 %v1288_v54, 0.0  ;;  %v1280_v61 = vadd.f32 %v2498_v51, %v1279_v58  ;;  %v1751_v62 = vpop.f32.mrf.mxu1 }
 0x194   : > { %v1717_v0 = vpack.c.bf16 %v1352_v55, %v1352_v55  ;;  %v1350_v3 = vmax.f32 %v1312_v59, 0.0  ;;  %v1743_v6 = vpop.f32.mrf.mxu0  ;;  %v1323_v50 = vadd.f32 %v1751_v62, %v2498_v51 }
 0x195   : > { %v1709_v63 = vpack.c.bf16 %v1344_v60, %v1344_v60  ;;  %v1342_v7 = vmax.f32 %v1280_v61, 0.0  ;;  %v1291_v53 = vadd.f32 %v1743_v6, %v2498_v51  ;;  %v1314_v9 = vpop.f32.mrf.mxu1 }
 0x196   : > { %1433 = vst.msk [vmem:[%s2506_s27 + $0x28] sm:$0xf] %vm1422_vm12, %v1717_v0  ;;  %v1715_v39 = vpack.c.bf16 %v1350_v3, %v1350_v3  ;;  %v1353_v12 = vmax.f32 %v1323_v50, 0.0  ;;  %v1282_v40 = vpop.f32.mrf.mxu0  ;;  %v1315_v14 = vadd.f32 %v2498_v51, %v1314_v9 }
 0x197   : > { %1425 = vst.msk [vmem:[%s2506_s27 + $0x8] sm:$0xf] %vm1422_vm12, %v1709_v63  ;;  %v1707_v15 = vpack.c.bf16 %v1342_v7, %v1342_v7  ;;  %v1345_v20 = vmax.f32 %v1291_v53, 0.0  ;;  %v1283_v25 = vadd.f32 %v2498_v51, %v1282_v40 }
 0x198   : > { %1431 = vst.msk [vmem:[%s2506_s27 + $0x20] sm:$0xf] %vm1422_vm12, %v1715_v39  ;;  %v1718_v4 = vpack.c.bf16 %v1353_v12, %v1353_v12  ;;  %v1351_v56 = vmax.f32 %v1315_v14, 0.0 }
 0x199   : > { %1423 = vst.msk [vmem:[%s2506_s27] sm:$0xf] %vm1422_vm12, %v1707_v15  ;;  %v1710_v21 = vpack.c.bf16 %v1345_v20, %v1345_v20  ;;  %v1343_v29 = vmax.f32 %v1283_v25, 0.0 }
 0x19a   : > { %1434 = vst.msk [vmem:[%s2506_s27 + $0x2c] sm:$0xf] %vm1422_vm12, %v1718_v4  ;;  %v1716_v16 = vpack.c.bf16 %v1351_v56, %v1351_v56 }
 0x19b   : > { %1426 = vst.msk [vmem:[%s2506_s27 + $0xc] sm:$0xf] %vm1422_vm12, %v1710_v21  ;;  %v1708_v18 = vpack.c.bf16 %v1343_v29, %v1343_v29 }
 0x19c   : > { %1432 = vst.msk [vmem:[%s2506_s27 + $0x24] sm:$0xf] %vm1422_vm12, %v1716_v16 }
 0x19d   : > { %1424 = vst.msk [vmem:[%s2506_s27 + $0x4] sm:$0xf] %vm1422_vm12, %v1708_v18 }
 0x1cb   : > { %v1754_v57 = vpop.f32.mrf.mxu1 }
 0x1cc   : > { %v1746_v23 = vpop.f32.mrf.mxu0  ;;  %v1336_v22 = vadd.f32 %v1754_v57, %v2498_v51 }
 0x1cd   : > { %v1304_v24 = vadd.f32 %v1746_v23, %v2498_v51  ;;  %v1327_v8 = vpop.f32.mrf.mxu1 }
 0x1ce   : > { %v1356_v26 = vmax.f32 %v1336_v22, 0.0  ;;  %v1295_v27 = vpop.f32.mrf.mxu0  ;;  %v1328_v30 = vadd.f32 %v2498_v51, %v1327_v8 }
 0x1cf   : > { %v1348_v32 = vmax.f32 %v1304_v24, 0.0  ;;  %v1296_v10 = vadd.f32 %v2498_v51, %v1295_v27  ;;  %v1755_v2 = vpop.f32.mrf.mxu1 }
 0x1d0   : > { %v1721_v28 = vpack.c.bf16 %v1356_v26, %v1356_v26  ;;  %v1354_v36 = vmax.f32 %v1328_v30, 0.0  ;;  %v1747_v37 = vpop.f32.mrf.mxu0  ;;  %v1339_v5 = vadd.f32 %v1755_v2, %v2498_v51 }
 0x1d1   : > { %v1713_v35 = vpack.c.bf16 %v1348_v32, %v1348_v32  ;;  %v1346_v31 = vmax.f32 %v1296_v10, 0.0  ;;  %v1307_v33 = vadd.f32 %v1747_v37, %v2498_v51  ;;  %v1330_v17 = vpop.f32.mrf.mxu1 }
 0x1d2   : > { %1437 = vst.msk [vmem:[%s2506_s27 + $0x38] sm:$0xf] %vm1422_vm12, %v1721_v28  ;;  %v1719_v38 = vpack.c.bf16 %v1354_v36, %v1354_v36  ;;  %v1357_v41 = vmax.f32 %v1339_v5, 0.0  ;;  %v1298_v19 = vpop.f32.mrf.mxu0  ;;  %v1331_v42 = vadd.f32 %v2498_v51, %v1330_v17 }
 0x1d3   : > { %1429 = vst.msk [vmem:[%s2506_s27 + $0x18] sm:$0xf] %vm1422_vm12, %v1713_v35  ;;  %v1711_v13 = vpack.c.bf16 %v1346_v31, %v1346_v31  ;;  %v1349_v43 = vmax.f32 %v1307_v33, 0.0  ;;  %v1299_v44 = vadd.f32 %v2498_v51, %v1298_v19 }
 0x1d4   : > { %1435 = vst.msk [vmem:[%s2506_s27 + $0x30] sm:$0xf] %vm1422_vm12, %v1719_v38  ;;  %v1722_v46 = vpack.c.bf16 %v1357_v41, %v1357_v41  ;;  %v1355_v47 = vmax.f32 %v1331_v42, 0.0 }
 0x1d5   : > { %1427 = vst.msk [vmem:[%s2506_s27 + $0x10] sm:$0xf] %vm1422_vm12, %v1711_v13  ;;  %v1714_v48 = vpack.c.bf16 %v1349_v43, %v1349_v43  ;;  %v1347_v45 = vmax.f32 %v1299_v44, 0.0 }
 0x1d6   : > { %1438 = vst.msk [vmem:[%s2506_s27 + $0x3c] sm:$0xf] %vm1422_vm12, %v1722_v46  ;;  %v1720_v49 = vpack.c.bf16 %v1355_v47, %v1355_v47 }
 0x1d7   : > { %1430 = vst.msk [vmem:[%s2506_s27 + $0x1c] sm:$0xf] %vm1422_vm12, %v1714_v48  ;;  %v1712_v52 = vpack.c.bf16 %v1347_v45, %v1347_v45 }
 0x1d8   : > { %1436 = vst.msk [vmem:[%s2506_s27 + $0x34] sm:$0xf] %vm1422_vm12, %v1720_v49 }
 0x1d9   : > { %1428 = vst.msk [vmem:[%s2506_s27 + $0x14] sm:$0xf] %vm1422_vm12, %v1712_v52 }
 0x1da PF: > { %s13_s16 = sadd.s32 1, %s1927_s16   ;;  %s2572_s12 = smov %s1919_s14 }
 0x1db   : > { %p10_p8 = scmp.ge.s32.totalorder %s13_s16, 6   ;;  %s2573_s13 = smov %s1923_s15 }
 0x1dc   : > { %s2574_s14 = smov %s2577_s17  ;;  %s2575_s15 = smov %s2581_s18 }
 0x1dd   :  { %12 = sbr.rel (!%p10_p8) target bundleno = 3 (0x3), region = 64 }

</bundles_post_ra>
